<compile_context>
chip_gen: v7x
topology: tpu7x:2x2x1
jax: 0.10.0
libtpu: 0.0.40
codegen_flags: <defaults>
</compile_context>

<pallas_src>
import math

import jax
import jax.numpy as jnp
from jax.experimental import pallas as pl
from jax.experimental.pallas import tpu as pltpu


def _round_up(a, m):
    return (a + m - 1) // m * m


def _choose_tiles(batch):
    """Pick (padded batch, batch tile, in-kernel sub-tile)."""
    lane = 128
    b_pad = _round_up(max(batch, 1), lane)
    if b_pad <= 2048:
        tb = b_pad                      # single grid step, still lane aligned
    else:
        tb = 2048                       # amortize per-grid-step pipeline overhead
        steps = _round_up(b_pad, tb) // tb
        # v7x: 2 TensorCores share the "parallel" grid axis -> prefer even counts.
        if steps % 2 == 1 and (_round_up(b_pad, 1024) // 1024) % 2 == 0:
            tb = 1024
        b_pad = _round_up(b_pad, tb)
    tsub = 256 if tb % 256 == 0 else 128
    return b_pad, tb, tsub


def _make_kernel(tsub, bcast_via_load):
    def kernel(x_ref, w1_ref, c0_ref, o_ref, xm1_ref):
        # x_ref:  (TB, Nin)      input tile, caller dtype (batch-major, no wrapper transpose)
        # w1_ref: (H, Nin)       clamp(W_nmu, 0, 1) with column 0 pre-scaled by clamp(W_nau)
        # c0_ref: (H, 1)         clamp(W_nau, -1, 1)^T (additive term of the folded j==0 factor)
        # o_ref:  (1, TB)        lane-dense output tile
        # xm1_ref:(rows, TSUB)   VMEM scratch holding (x - 1)^T for the current sub-tile
        tb, n_in = x_ref.shape
        n_hidden = w1_ref.shape[0]

        def xrow(j):
            # (x[:, j] - 1) replicated to (H, TSUB), batch on lanes.
            if bcast_via_load:
                # stride-0 sublane-broadcast load: the replication happens on the
                # vector-load slots (3/cycle, idle here) instead of the XLU.
                return xm1_ref[pl.ds(j, n_hidden, stride=0), :]
            return jnp.broadcast_to(xm1_ref[pl.ds(j, 1), :], (n_hidden, tsub))

        def sub_tile(s, carry):
            off = pl.multiple_of(s * tsub, tsub)
            # In-kernel transpose of this (TSUB, Nin) slice so batch sits on the
            # lane axis; subtract 1 once and park it in VMEM for per-j re-reads.
            x_sub = x_ref[pl.ds(off, tsub), :]                        # (TSUB, Nin)
            xm1_ref[pl.ds(0, n_in), :] = x_sub.T.astype(jnp.float32) - 1.0

            # j == 0 NMU factor with the NAU weight folded in:
            #   acc = (w2*w1[:,0]) * (x0 - 1) + w2
            acc = w1_ref[:, pl.ds(0, 1)] * xrow(0) + c0_ref[...]      # (H, TSUB)
            # Remaining factors: t_j = w1_j * (x_j - 1) + 1  (static unroll over Nin).
            for j in range(1, n_in):
                acc = acc * (w1_ref[:, pl.ds(j, 1)] * xrow(j) + 1.0)

            # NAU contraction == sublane reduce -> lane-dense (1, TSUB) row.
            o_ref[:, pl.ds(off, tsub)] = jnp.sum(acc, axis=0, keepdims=True)
            return carry

        jax.lax.fori_loop(0, tb // tsub, sub_tile, 0)

    return kernel


def _forward_impl(x, w_nmu, w_nau, *, bcast_via_load):
    batch, n_in = x.shape
    n_hidden, n_in_w = w_nmu.shape
    assert n_in == n_in_w
    assert w_nau.shape == (1, n_hidden)

    # ---- weight prep hoisted out of the kernel (done once per call) ----
    w1 = jnp.clip(w_nmu.astype(jnp.float32), 0.0, 1.0)            # (H, Nin)
    w2 = jnp.clip(w_nau.astype(jnp.float32), -1.0, 1.0)           # (1, H)
    # Fold the NAU weight into the j == 0 NMU factor:
    #   out[b] = sum_h w2[h] * prod_j (w1[h,j]*(x[b,j]-1) + 1)
    #          = sum_h [ (w2[h]*w1[h,0])*(x[b,0]-1) + w2[h] ] * prod_{j>0}(...)
    w1f = jnp.concatenate([w1[:, :1] * w2.T, w1[:, 1:]], axis=1)   # (H, Nin)
    c0 = w2.T                                                      # (H, 1)

    # ---- batch tiling: pad ragged batches, lane-aligned tiles, sliced output ----
    b_pad, tb, tsub = _choose_tiles(batch)
    x_in = x if batch == b_pad else jnp.pad(x, ((0, b_pad - batch), (0, 0)))

    # Scratch rows padded so even a naive extent check of the stride-0 broadcast
    # slice (start j, size H) stays in bounds; only the first Nin rows are written.
    scratch_rows = _round_up(n_in + n_hidden, 8)

    out = pl.pallas_call(
        _make_kernel(tsub, bcast_via_load),
        out_shape=jax.ShapeDtypeStruct((1, b_pad), jnp.float32),
        grid_spec=pltpu.PrefetchScalarGridSpec(
            num_scalar_prefetch=0,
            grid=(b_pad // tb,),
            in_specs=[
                # x in its natural (B, Nin) layout; widened to f32 in-kernel so
                # bf16 callers only DMA half the HBM bytes.
                pl.BlockSpec((tb, n_in), lambda i: (i, 0)),
                pl.BlockSpec((n_hidden, n_in), lambda i: (0, 0)),   # folded clamp(W_nmu)
                pl.BlockSpec((n_hidden, 1), lambda i: (0, 0)),      # clamp(W_nau)^T
            ],
            out_specs=pl.BlockSpec((1, tb), lambda i: (0, i)),
            scratch_shapes=[pltpu.VMEM((scratch_rows, tsub), jnp.float32)],
        ),
        compiler_params=pltpu.CompilerParams(
            dimension_semantics=("parallel",),
        ),
    )(x_in, w1f, c0)

    # Layout plumbing only: lane-dense (1, B_pad) slab -> (B, 1) module output.
    return out[0, :batch].reshape(batch, 1)


def leibniz_forward(x, w_nmu, w_nau):
    """LeibnizModule forward: NMU(input_size -> n_hidden) followed by NAU(n_hidden -> 1)."""
    try:
        return _forward_impl(x, w_nmu, w_nau, bcast_via_load=True)
    except Exception:
        # TODO(synk): this jax/Mosaic build rejected stride-0 sublane-broadcast
        # slices; fall back to an explicit broadcast (same math, XLU does the
        # row replication -> modestly slower on the 2-XLU chips v6e/v7x).
        return _forward_impl(x, w_nmu, w_nau, bcast_via_load=False)


def reference_forward(x, w_nmu, w_nau):
    w1 = jnp.clip(w_nmu.astype(jnp.float32), 0.0, 1.0)
    w2 = jnp.clip(w_nau.astype(jnp.float32), -1.0, 1.0)
    t = w1[None, :, :] * x.astype(jnp.float32)[:, None, :] + 1.0 - w1[None, :, :]
    z = jnp.prod(t, axis=-1)
    return z @ w2.T


if __name__ == "__main__":
    # Small shapes consistent with the module: batch=8, input_size=16, n_hidden=32.
    B, NIN, H = 8, 16, 32

    key = jax.random.PRNGKey(0)
    kx, k_nmu, k_nau, kx2 = jax.random.split(key, 4)

    # Deterministic parameter init mirroring the PyTorch reset_parameters():
    #   NMU: uniform(0.5 - r, 0.5 + r), r = min(0.25, sqrt(3)*sqrt(0.25)) = 0.25
    #   NAU: uniform(-r, r),            r = min(0.5,  sqrt(3)*sqrt(2/(H + 1)))
    w_nmu = jax.random.uniform(k_nmu, (H, NIN), jnp.float32, minval=0.25, maxval=0.75)
    r_nau = min(0.5, math.sqrt(3.0) * math.sqrt(2.0 / (H + 1)))
    w_nau = jax.random.uniform(k_nau, (1, H), jnp.float32, minval=-r_nau, maxval=r_nau)

    x = jax.random.uniform(kx, (B, NIN), jnp.float32, minval=-1.0, maxval=1.0)

    out = jax.block_until_ready(leibniz_forward(x, w_nmu, w_nau))
    ref = reference_forward(x, w_nmu, w_nau)
    assert out.shape == (B, 1)
    assert jnp.allclose(out, ref, atol=1e-5, rtol=1e-4)

    # Ragged, multi-sub-tile batch exercising the padding + in-kernel tiling path.
    x2 = jax.random.uniform(kx2, (300, NIN), jnp.float32, minval=-1.0, maxval=1.0)
    out2 = jax.block_until_ready(leibniz_forward(x2, w_nmu, w_nau))
    ref2 = reference_forward(x2, w_nmu, w_nau)
    assert out2.shape == (300, 1)
    assert jnp.allclose(out2, ref2, atol=1e-5, rtol=1e-4)

    print("KERNEL_OK")
</pallas_src>

<mosaic_0001>
module attributes {stable_mosaic.version = 11 : i64} {
  func.func @kernel(%arg0: i32, %arg1: memref<128x16xf32, #tpu.memory_space<vmem>>, %arg2: memref<32x16xf32, #tpu.memory_space<vmem>>, %arg3: memref<32x1xf32, #tpu.memory_space<vmem>>, %arg4: memref<1x128xf32, #tpu.memory_space<vmem>>, %arg5: memref<48x128xf32, #tpu.memory_space<vmem>>) attributes {dimension_semantics = [#tpu.dimension_semantics<parallel>], iteration_bounds = array<i64: 1>, scalar_prefetch = 0 : i64, scratch_operands = 1 : i64, tpu.core_type = #tpu.core_type<tc>, window_params = [{transform_indices = @transform_0, window_bounds = array<i64: 128, 16>}, {pipeline_mode = #tpu.pipeline_mode<synchronous>, transform_indices = @transform_1, window_bounds = array<i64: 32, 16>}, {pipeline_mode = #tpu.pipeline_mode<synchronous>, transform_indices = @transform_2, window_bounds = array<i64: 32, 1>}, {transform_indices = @transform_3, window_bounds = array<i64: 1, 128>}]} {
    %c0_i32 = arith.constant 0 : i32
    %c128_i32 = arith.constant 128 : i32
    %0 = arith.muli %c0_i32, %c128_i32 : i32
    %1 = tpu.assume_multiple %0, 128 : i32
    %2 = arith.index_cast %1 : i32 to index
    %c0 = arith.constant 0 : index
    %3 = vector.load %arg1[%2, %c0] : memref<128x16xf32, #tpu.memory_space<vmem>>, vector<128x16xf32>
    %4 = tpu.transpose %3, [1, 0] : vector<128x16xf32> -> vector<16x128xf32>
    %cst = arith.constant 1.000000e+00 : f32
    %5 = vector.broadcast %cst : f32 to vector<16x128xf32>
    %6 = arith.subf %4, %5 : vector<16x128xf32>
    %c0_0 = arith.constant 0 : index
    %c0_1 = arith.constant 0 : index
    %7 = vector.load %arg5[%c0_0, %c0_1] : memref<48x128xf32, #tpu.memory_space<vmem>>, vector<16x128xf32>
    tpu.vector_store %arg5[%c0_0, %c0_1], %6 {strides = array<i32>} : memref<48x128xf32, #tpu.memory_space<vmem>>, vector<16x128xf32>,
    %c0_2 = arith.constant 0 : index
    %c0_3 = arith.constant 0 : index
    %8 = vector.load %arg2[%c0_2, %c0_3] : memref<32x16xf32, #tpu.memory_space<vmem>>, vector<32x1xf32>
    %c0_4 = arith.constant 0 : index
    %c0_5 = arith.constant 0 : index
    %9 = tpu.strided_load %arg5[%c0_4, %c0_5] {strides = array<i32: 0, 1>} : memref<48x128xf32, #tpu.memory_space<vmem>>, vector<32x128xf32>
    %10 = vector.broadcast %8 : vector<32x1xf32> to vector<32x128xf32>
    %11 = arith.mulf %10, %9 : vector<32x128xf32>
    %c0_6 = arith.constant 0 : index
    %c0_7 = arith.constant 0 : index
    %12 = vector.load %arg3[%c0_6, %c0_7] : memref<32x1xf32, #tpu.memory_space<vmem>>, vector<32x1xf32>
    %13 = vector.broadcast %12 : vector<32x1xf32> to vector<32x128xf32>
    %14 = arith.addf %11, %13 : vector<32x128xf32>
    %c0_8 = arith.constant 0 : index
    %c1 = arith.constant 1 : index
    %15 = vector.load %arg2[%c0_8, %c1] : memref<32x16xf32, #tpu.memory_space<vmem>>, vector<32x1xf32>
    %c1_9 = arith.constant 1 : index
    %c0_10 = arith.constant 0 : index
    %16 = tpu.strided_load %arg5[%c1_9, %c0_10] {strides = array<i32: 0, 1>} : memref<48x128xf32, #tpu.memory_space<vmem>>, vector<32x128xf32>
    %17 = vector.broadcast %15 : vector<32x1xf32> to vector<32x128xf32>
    %18 = arith.mulf %17, %16 : vector<32x128xf32>
    %cst_11 = arith.constant 1.000000e+00 : f32
    %19 = vector.broadcast %cst_11 : f32 to vector<32x128xf32>
    %20 = arith.addf %18, %19 : vector<32x128xf32>
    %21 = arith.mulf %14, %20 : vector<32x128xf32>
    %c0_12 = arith.constant 0 : index
    %c2 = arith.constant 2 : index
    %22 = vector.load %arg2[%c0_12, %c2] : memref<32x16xf32, #tpu.memory_space<vmem>>, vector<32x1xf32>
    %c2_13 = arith.constant 2 : index
    %c0_14 = arith.constant 0 : index
    %23 = tpu.strided_load %arg5[%c2_13, %c0_14] {strides = array<i32: 0, 1>} : memref<48x128xf32, #tpu.memory_space<vmem>>, vector<32x128xf32>
    %24 = vector.broadcast %22 : vector<32x1xf32> to vector<32x128xf32>
    %25 = arith.mulf %24, %23 : vector<32x128xf32>
    %cst_15 = arith.constant 1.000000e+00 : f32
    %26 = vector.broadcast %cst_15 : f32 to vector<32x128xf32>
    %27 = arith.addf %25, %26 : vector<32x128xf32>
    %28 = arith.mulf %21, %27 : vector<32x128xf32>
    %c0_16 = arith.constant 0 : index
    %c3 = arith.constant 3 : index
    %29 = vector.load %arg2[%c0_16, %c3] : memref<32x16xf32, #tpu.memory_space<vmem>>, vector<32x1xf32>
    %c3_17 = arith.constant 3 : index
    %c0_18 = arith.constant 0 : index
    %30 = tpu.strided_load %arg5[%c3_17, %c0_18] {strides = array<i32: 0, 1>} : memref<48x128xf32, #tpu.memory_space<vmem>>, vector<32x128xf32>
    %31 = vector.broadcast %29 : vector<32x1xf32> to vector<32x128xf32>
    %32 = arith.mulf %31, %30 : vector<32x128xf32>
    %cst_19 = arith.constant 1.000000e+00 : f32
    %33 = vector.broadcast %cst_19 : f32 to vector<32x128xf32>
    %34 = arith.addf %32, %33 : vector<32x128xf32>
    %35 = arith.mulf %28, %34 : vector<32x128xf32>
    %c0_20 = arith.constant 0 : index
    %c4 = arith.constant 4 : index
    %36 = vector.load %arg2[%c0_20, %c4] : memref<32x16xf32, #tpu.memory_space<vmem>>, vector<32x1xf32>
    %c4_21 = arith.constant 4 : index
    %c0_22 = arith.constant 0 : index
    %37 = tpu.strided_load %arg5[%c4_21, %c0_22] {strides = array<i32: 0, 1>} : memref<48x128xf32, #tpu.memory_space<vmem>>, vector<32x128xf32>
    %38 = vector.broadcast %36 : vector<32x1xf32> to vector<32x128xf32>
    %39 = arith.mulf %38, %37 : vector<32x128xf32>
    %cst_23 = arith.constant 1.000000e+00 : f32
    %40 = vector.broadcast %cst_23 : f32 to vector<32x128xf32>
    %41 = arith.addf %39, %40 : vector<32x128xf32>
    %42 = arith.mulf %35, %41 : vector<32x128xf32>
    %c0_24 = arith.constant 0 : index
    %c5 = arith.constant 5 : index
    %43 = vector.load %arg2[%c0_24, %c5] : memref<32x16xf32, #tpu.memory_space<vmem>>, vector<32x1xf32>
    %c5_25 = arith.constant 5 : index
    %c0_26 = arith.constant 0 : index
    %44 = tpu.strided_load %arg5[%c5_25, %c0_26] {strides = array<i32: 0, 1>} : memref<48x128xf32, #tpu.memory_space<vmem>>, vector<32x128xf32>
    %45 = vector.broadcast %43 : vector<32x1xf32> to vector<32x128xf32>
    %46 = arith.mulf %45, %44 : vector<32x128xf32>
    %cst_27 = arith.constant 1.000000e+00 : f32
    %47 = vector.broadcast %cst_27 : f32 to vector<32x128xf32>
    %48 = arith.addf %46, %47 : vector<32x128xf32>
    %49 = arith.mulf %42, %48 : vector<32x128xf32>
    %c0_28 = arith.constant 0 : index
    %c6 = arith.constant 6 : index
    %50 = vector.load %arg2[%c0_28, %c6] : memref<32x16xf32, #tpu.memory_space<vmem>>, vector<32x1xf32>
    %c6_29 = arith.constant 6 : index
    %c0_30 = arith.constant 0 : index
    %51 = tpu.strided_load %arg5[%c6_29, %c0_30] {strides = array<i32: 0, 1>} : memref<48x128xf32, #tpu.memory_space<vmem>>, vector<32x128xf32>
    %52 = vector.broadcast %50 : vector<32x1xf32> to vector<32x128xf32>
    %53 = arith.mulf %52, %51 : vector<32x128xf32>
    %cst_31 = arith.constant 1.000000e+00 : f32
    %54 = vector.broadcast %cst_31 : f32 to vector<32x128xf32>
    %55 = arith.addf %53, %54 : vector<32x128xf32>
    %56 = arith.mulf %49, %55 : vector<32x128xf32>
    %c0_32 = arith.constant 0 : index
    %c7 = arith.constant 7 : index
    %57 = vector.load %arg2[%c0_32, %c7] : memref<32x16xf32, #tpu.memory_space<vmem>>, vector<32x1xf32>
    %c7_33 = arith.constant 7 : index
    %c0_34 = arith.constant 0 : index
    %58 = tpu.strided_load %arg5[%c7_33, %c0_34] {strides = array<i32: 0, 1>} : memref<48x128xf32, #tpu.memory_space<vmem>>, vector<32x128xf32>
    %59 = vector.broadcast %57 : vector<32x1xf32> to vector<32x128xf32>
    %60 = arith.mulf %59, %58 : vector<32x128xf32>
    %cst_35 = arith.constant 1.000000e+00 : f32
    %61 = vector.broadcast %cst_35 : f32 to vector<32x128xf32>
    %62 = arith.addf %60, %61 : vector<32x128xf32>
    %63 = arith.mulf %56, %62 : vector<32x128xf32>
    %c0_36 = arith.constant 0 : index
    %c8 = arith.constant 8 : index
    %64 = vector.load %arg2[%c0_36, %c8] : memref<32x16xf32, #tpu.memory_space<vmem>>, vector<32x1xf32>
    %c8_37 = arith.constant 8 : index
    %c0_38 = arith.constant 0 : index
    %65 = tpu.strided_load %arg5[%c8_37, %c0_38] {strides = array<i32: 0, 1>} : memref<48x128xf32, #tpu.memory_space<vmem>>, vector<32x128xf32>
    %66 = vector.broadcast %64 : vector<32x1xf32> to vector<32x128xf32>
    %67 = arith.mulf %66, %65 : vector<32x128xf32>
    %cst_39 = arith.constant 1.000000e+00 : f32
    %68 = vector.broadcast %cst_39 : f32 to vector<32x128xf32>
    %69 = arith.addf %67, %68 : vector<32x128xf32>
    %70 = arith.mulf %63, %69 : vector<32x128xf32>
    %c0_40 = arith.constant 0 : index
    %c9 = arith.constant 9 : index
    %71 = vector.load %arg2[%c0_40, %c9] : memref<32x16xf32, #tpu.memory_space<vmem>>, vector<32x1xf32>
    %c9_41 = arith.constant 9 : index
    %c0_42 = arith.constant 0 : index
    %72 = tpu.strided_load %arg5[%c9_41, %c0_42] {strides = array<i32: 0, 1>} : memref<48x128xf32, #tpu.memory_space<vmem>>, vector<32x128xf32>
    %73 = vector.broadcast %71 : vector<32x1xf32> to vector<32x128xf32>
    %74 = arith.mulf %73, %72 : vector<32x128xf32>
    %cst_43 = arith.constant 1.000000e+00 : f32
    %75 = vector.broadcast %cst_43 : f32 to vector<32x128xf32>
    %76 = arith.addf %74, %75 : vector<32x128xf32>
    %77 = arith.mulf %70, %76 : vector<32x128xf32>
    %c0_44 = arith.constant 0 : index
    %c10 = arith.constant 10 : index
    %78 = vector.load %arg2[%c0_44, %c10] : memref<32x16xf32, #tpu.memory_space<vmem>>, vector<32x1xf32>
    %c10_45 = arith.constant 10 : index
    %c0_46 = arith.constant 0 : index
    %79 = tpu.strided_load %arg5[%c10_45, %c0_46] {strides = array<i32: 0, 1>} : memref<48x128xf32, #tpu.memory_space<vmem>>, vector<32x128xf32>
    %80 = vector.broadcast %78 : vector<32x1xf32> to vector<32x128xf32>
    %81 = arith.mulf %80, %79 : vector<32x128xf32>
    %cst_47 = arith.constant 1.000000e+00 : f32
    %82 = vector.broadcast %cst_47 : f32 to vector<32x128xf32>
    %83 = arith.addf %81, %82 : vector<32x128xf32>
    %84 = arith.mulf %77, %83 : vector<32x128xf32>
    %c0_48 = arith.constant 0 : index
    %c11 = arith.constant 11 : index
    %85 = vector.load %arg2[%c0_48, %c11] : memref<32x16xf32, #tpu.memory_space<vmem>>, vector<32x1xf32>
    %c11_49 = arith.constant 11 : index
    %c0_50 = arith.constant 0 : index
    %86 = tpu.strided_load %arg5[%c11_49, %c0_50] {strides = array<i32: 0, 1>} : memref<48x128xf32, #tpu.memory_space<vmem>>, vector<32x128xf32>
    %87 = vector.broadcast %85 : vector<32x1xf32> to vector<32x128xf32>
    %88 = arith.mulf %87, %86 : vector<32x128xf32>
    %cst_51 = arith.constant 1.000000e+00 : f32
    %89 = vector.broadcast %cst_51 : f32 to vector<32x128xf32>
    %90 = arith.addf %88, %89 : vector<32x128xf32>
    %91 = arith.mulf %84, %90 : vector<32x128xf32>
    %c0_52 = arith.constant 0 : index
    %c12 = arith.constant 12 : index
    %92 = vector.load %arg2[%c0_52, %c12] : memref<32x16xf32, #tpu.memory_space<vmem>>, vector<32x1xf32>
    %c12_53 = arith.constant 12 : index
    %c0_54 = arith.constant 0 : index
    %93 = tpu.strided_load %arg5[%c12_53, %c0_54] {strides = array<i32: 0, 1>} : memref<48x128xf32, #tpu.memory_space<vmem>>, vector<32x128xf32>
    %94 = vector.broadcast %92 : vector<32x1xf32> to vector<32x128xf32>
    %95 = arith.mulf %94, %93 : vector<32x128xf32>
    %cst_55 = arith.constant 1.000000e+00 : f32
    %96 = vector.broadcast %cst_55 : f32 to vector<32x128xf32>
    %97 = arith.addf %95, %96 : vector<32x128xf32>
    %98 = arith.mulf %91, %97 : vector<32x128xf32>
    %c0_56 = arith.constant 0 : index
    %c13 = arith.constant 13 : index
    %99 = vector.load %arg2[%c0_56, %c13] : memref<32x16xf32, #tpu.memory_space<vmem>>, vector<32x1xf32>
    %c13_57 = arith.constant 13 : index
    %c0_58 = arith.constant 0 : index
    %100 = tpu.strided_load %arg5[%c13_57, %c0_58] {strides = array<i32: 0, 1>} : memref<48x128xf32, #tpu.memory_space<vmem>>, vector<32x128xf32>
    %101 = vector.broadcast %99 : vector<32x1xf32> to vector<32x128xf32>
    %102 = arith.mulf %101, %100 : vector<32x128xf32>
    %cst_59 = arith.constant 1.000000e+00 : f32
    %103 = vector.broadcast %cst_59 : f32 to vector<32x128xf32>
    %104 = arith.addf %102, %103 : vector<32x128xf32>
    %105 = arith.mulf %98, %104 : vector<32x128xf32>
    %c0_60 = arith.constant 0 : index
    %c14 = arith.constant 14 : index
    %106 = vector.load %arg2[%c0_60, %c14] : memref<32x16xf32, #tpu.memory_space<vmem>>, vector<32x1xf32>
    %c14_61 = arith.constant 14 : index
    %c0_62 = arith.constant 0 : index
    %107 = tpu.strided_load %arg5[%c14_61, %c0_62] {strides = array<i32: 0, 1>} : memref<48x128xf32, #tpu.memory_space<vmem>>, vector<32x128xf32>
    %108 = vector.broadcast %106 : vector<32x1xf32> to vector<32x128xf32>
    %109 = arith.mulf %108, %107 : vector<32x128xf32>
    %cst_63 = arith.constant 1.000000e+00 : f32
    %110 = vector.broadcast %cst_63 : f32 to vector<32x128xf32>
    %111 = arith.addf %109, %110 : vector<32x128xf32>
    %112 = arith.mulf %105, %111 : vector<32x128xf32>
    %c0_64 = arith.constant 0 : index
    %c15 = arith.constant 15 : index
    %113 = vector.load %arg2[%c0_64, %c15] : memref<32x16xf32, #tpu.memory_space<vmem>>, vector<32x1xf32>
    %c15_65 = arith.constant 15 : index
    %c0_66 = arith.constant 0 : index
    %114 = tpu.strided_load %arg5[%c15_65, %c0_66] {strides = array<i32: 0, 1>} : memref<48x128xf32, #tpu.memory_space<vmem>>, vector<32x128xf32>
    %115 = vector.broadcast %113 : vector<32x1xf32> to vector<32x128xf32>
    %116 = arith.mulf %115, %114 : vector<32x128xf32>
    %cst_67 = arith.constant 1.000000e+00 : f32
    %117 = vector.broadcast %cst_67 : f32 to vector<32x128xf32>
    %118 = arith.addf %116, %117 : vector<32x128xf32>
    %119 = arith.mulf %112, %118 : vector<32x128xf32>
    %cst_68 = arith.constant dense<0.000000e+00> : vector<128xf32>
    %120 = vector.multi_reduction <add>, %119, %cst_68 [0] : vector<32x128xf32> to vector<128xf32>
    %121 = vector.shape_cast %120 : vector<128xf32> to vector<1x128xf32>
    %c0_69 = arith.constant 0 : index
    %122 = arith.index_cast %1 : i32 to index
    %123 = vector.load %arg4[%c0_69, %122] : memref<1x128xf32, #tpu.memory_space<vmem>>, vector<1x128xf32>
    tpu.vector_store %arg4[%c0_69, %122], %121 {strides = array<i32>} : memref<1x128xf32, #tpu.memory_space<vmem>>, vector<1x128xf32>,
    %c1_i32 = arith.constant 1 : i32
    return
  }
  func.func @transform_0(%arg0: i32) -> (i32, i32) {
    %c0_i32 = arith.constant 0 : i32
    %c0_i32_0 = arith.constant 0 : i32
    return %arg0, %c0_i32 : i32, i32
  }
  func.func @transform_1(%arg0: i32) -> (i32, i32) {
    %c0_i32 = arith.constant 0 : i32
    %c0_i32_0 = arith.constant 0 : i32
    %c0_i32_1 = arith.constant 0 : i32
    return %c0_i32, %c0_i32_0 : i32, i32
  }
  func.func @transform_2(%arg0: i32) -> (i32, i32) {
    %c0_i32 = arith.constant 0 : i32
    %c0_i32_0 = arith.constant 0 : i32
    %c0_i32_1 = arith.constant 0 : i32
    return %c0_i32, %c0_i32_0 : i32, i32
  }
  func.func @transform_3(%arg0: i32) -> (i32, i32) {
    %c0_i32 = arith.constant 0 : i32
    %c0_i32_0 = arith.constant 0 : i32
    return %c0_i32, %arg0 : i32, i32
  }
}

module attributes {stable_mosaic.version = 11 : i64} {
  func.func @kernel(%arg0: i32, %arg1: memref<128x16xf32, #tpu.memory_space<vmem>>, %arg2: memref<32x16xf32, #tpu.memory_space<vmem>>, %arg3: memref<32x1xf32, #tpu.memory_space<vmem>>, %arg4: memref<1x128xf32, #tpu.memory_space<vmem>>, %arg5: memref<48x128xf32, #tpu.memory_space<vmem>>) attributes {dimension_semantics = [#tpu.dimension_semantics<parallel>], iteration_bounds = array<i64: 1>, scalar_prefetch = 0 : i64, scratch_operands = 1 : i64, tpu.core_type = #tpu.core_type<tc>, window_params = [{transform_indices = @transform_0, window_bounds = array<i64: 128, 16>}, {pipeline_mode = #tpu.pipeline_mode<synchronous>, transform_indices = @transform_1, window_bounds = array<i64: 32, 16>}, {pipeline_mode = #tpu.pipeline_mode<synchronous>, transform_indices = @transform_2, window_bounds = array<i64: 32, 1>}, {transform_indices = @transform_3, window_bounds = array<i64: 1, 128>}]} {
    %c0_i32 = arith.constant 0 : i32
    %c128_i32 = arith.constant 128 : i32
    %0 = arith.muli %c0_i32, %c128_i32 : i32
    %1 = tpu.assume_multiple %0, 128 : i32
    %2 = arith.index_cast %1 : i32 to index
    %c0 = arith.constant 0 : index
    %3 = vector.load %arg1[%2, %c0] : memref<128x16xf32, #tpu.memory_space<vmem>>, vector<128x16xf32>
    %4 = tpu.transpose %3, [1, 0] : vector<128x16xf32> -> vector<16x128xf32>
    %cst = arith.constant 1.000000e+00 : f32
    %5 = vector.broadcast %cst : f32 to vector<16x128xf32>
    %6 = arith.subf %4, %5 : vector<16x128xf32>
    %c0_0 = arith.constant 0 : index
    %c0_1 = arith.constant 0 : index
    %7 = vector.load %arg5[%c0_0, %c0_1] : memref<48x128xf32, #tpu.memory_space<vmem>>, vector<16x128xf32>
    tpu.vector_store %arg5[%c0_0, %c0_1], %6 {strides = array<i32>} : memref<48x128xf32, #tpu.memory_space<vmem>>, vector<16x128xf32>,
    %c0_2 = arith.constant 0 : index
    %c0_3 = arith.constant 0 : index
    %8 = vector.load %arg2[%c0_2, %c0_3] : memref<32x16xf32, #tpu.memory_space<vmem>>, vector<32x1xf32>
    %c0_4 = arith.constant 0 : index
    %c0_5 = arith.constant 0 : index
    %9 = vector.load %arg5[%c0_4, %c0_5] : memref<48x128xf32, #tpu.memory_space<vmem>>, vector<1x128xf32>
    %10 = vector.shape_cast %9 : vector<1x128xf32> to vector<1x128xf32>
    %11 = vector.broadcast %10 : vector<1x128xf32> to vector<32x128xf32>
    %12 = vector.broadcast %8 : vector<32x1xf32> to vector<32x128xf32>
    %13 = arith.mulf %12, %11 : vector<32x128xf32>
    %c0_6 = arith.constant 0 : index
    %c0_7 = arith.constant 0 : index
    %14 = vector.load %arg3[%c0_6, %c0_7] : memref<32x1xf32, #tpu.memory_space<vmem>>, vector<32x1xf32>
    %15 = vector.broadcast %14 : vector<32x1xf32> to vector<32x128xf32>
    %16 = arith.addf %13, %15 : vector<32x128xf32>
    %c0_8 = arith.constant 0 : index
    %c1 = arith.constant 1 : index
    %17 = vector.load %arg2[%c0_8, %c1] : memref<32x16xf32, #tpu.memory_space<vmem>>, vector<32x1xf32>
    %c1_9 = arith.constant 1 : index
    %c0_10 = arith.constant 0 : index
    %18 = vector.load %arg5[%c1_9, %c0_10] : memref<48x128xf32, #tpu.memory_space<vmem>>, vector<1x128xf32>
    %19 = vector.shape_cast %18 : vector<1x128xf32> to vector<1x128xf32>
    %20 = vector.broadcast %19 : vector<1x128xf32> to vector<32x128xf32>
    %21 = vector.broadcast %17 : vector<32x1xf32> to vector<32x128xf32>
    %22 = arith.mulf %21, %20 : vector<32x128xf32>
    %cst_11 = arith.constant 1.000000e+00 : f32
    %23 = vector.broadcast %cst_11 : f32 to vector<32x128xf32>
    %24 = arith.addf %22, %23 : vector<32x128xf32>
    %25 = arith.mulf %16, %24 : vector<32x128xf32>
    %c0_12 = arith.constant 0 : index
    %c2 = arith.constant 2 : index
    %26 = vector.load %arg2[%c0_12, %c2] : memref<32x16xf32, #tpu.memory_space<vmem>>, vector<32x1xf32>
    %c2_13 = arith.constant 2 : index
    %c0_14 = arith.constant 0 : index
    %27 = vector.load %arg5[%c2_13, %c0_14] : memref<48x128xf32, #tpu.memory_space<vmem>>, vector<1x128xf32>
    %28 = vector.shape_cast %27 : vector<1x128xf32> to vector<1x128xf32>
    %29 = vector.broadcast %28 : vector<1x128xf32> to vector<32x128xf32>
    %30 = vector.broadcast %26 : vector<32x1xf32> to vector<32x128xf32>
    %31 = arith.mulf %30, %29 : vector<32x128xf32>
    %cst_15 = arith.constant 1.000000e+00 : f32
    %32 = vector.broadcast %cst_15 : f32 to vector<32x128xf32>
    %33 = arith.addf %31, %32 : vector<32x128xf32>
    %34 = arith.mulf %25, %33 : vector<32x128xf32>
    %c0_16 = arith.constant 0 : index
    %c3 = arith.constant 3 : index
    %35 = vector.load %arg2[%c0_16, %c3] : memref<32x16xf32, #tpu.memory_space<vmem>>, vector<32x1xf32>
    %c3_17 = arith.constant 3 : index
    %c0_18 = arith.constant 0 : index
    %36 = vector.load %arg5[%c3_17, %c0_18] : memref<48x128xf32, #tpu.memory_space<vmem>>, vector<1x128xf32>
    %37 = vector.shape_cast %36 : vector<1x128xf32> to vector<1x128xf32>
    %38 = vector.broadcast %37 : vector<1x128xf32> to vector<32x128xf32>
    %39 = vector.broadcast %35 : vector<32x1xf32> to vector<32x128xf32>
    %40 = arith.mulf %39, %38 : vector<32x128xf32>
    %cst_19 = arith.constant 1.000000e+00 : f32
    %41 = vector.broadcast %cst_19 : f32 to vector<32x128xf32>
    %42 = arith.addf %40, %41 : vector<32x128xf32>
    %43 = arith.mulf %34, %42 : vector<32x128xf32>
    %c0_20 = arith.constant 0 : index
    %c4 = arith.constant 4 : index
    %44 = vector.load %arg2[%c0_20, %c4] : memref<32x16xf32, #tpu.memory_space<vmem>>, vector<32x1xf32>
    %c4_21 = arith.constant 4 : index
    %c0_22 = arith.constant 0 : index
    %45 = vector.load %arg5[%c4_21, %c0_22] : memref<48x128xf32, #tpu.memory_space<vmem>>, vector<1x128xf32>
    %46 = vector.shape_cast %45 : vector<1x128xf32> to vector<1x128xf32>
    %47 = vector.broadcast %46 : vector<1x128xf32> to vector<32x128xf32>
    %48 = vector.broadcast %44 : vector<32x1xf32> to vector<32x128xf32>
    %49 = arith.mulf %48, %47 : vector<32x128xf32>
    %cst_23 = arith.constant 1.000000e+00 : f32
    %50 = vector.broadcast %cst_23 : f32 to vector<32x128xf32>
    %51 = arith.addf %49, %50 : vector<32x128xf32>
    %52 = arith.mulf %43, %51 : vector<32x128xf32>
    %c0_24 = arith.constant 0 : index
    %c5 = arith.constant 5 : index
    %53 = vector.load %arg2[%c0_24, %c5] : memref<32x16xf32, #tpu.memory_space<vmem>>, vector<32x1xf32>
    %c5_25 = arith.constant 5 : index
    %c0_26 = arith.constant 0 : index
    %54 = vector.load %arg5[%c5_25, %c0_26] : memref<48x128xf32, #tpu.memory_space<vmem>>, vector<1x128xf32>
    %55 = vector.shape_cast %54 : vector<1x128xf32> to vector<1x128xf32>
    %56 = vector.broadcast %55 : vector<1x128xf32> to vector<32x128xf32>
    %57 = vector.broadcast %53 : vector<32x1xf32> to vector<32x128xf32>
    %58 = arith.mulf %57, %56 : vector<32x128xf32>
    %cst_27 = arith.constant 1.000000e+00 : f32
    %59 = vector.broadcast %cst_27 : f32 to vector<32x128xf32>
    %60 = arith.addf %58, %59 : vector<32x128xf32>
    %61 = arith.mulf %52, %60 : vector<32x128xf32>
    %c0_28 = arith.constant 0 : index
    %c6 = arith.constant 6 : index
    %62 = vector.load %arg2[%c0_28, %c6] : memref<32x16xf32, #tpu.memory_space<vmem>>, vector<32x1xf32>
    %c6_29 = arith.constant 6 : index
    %c0_30 = arith.constant 0 : index
    %63 = vector.load %arg5[%c6_29, %c0_30] : memref<48x128xf32, #tpu.memory_space<vmem>>, vector<1x128xf32>
    %64 = vector.shape_cast %63 : vector<1x128xf32> to vector<1x128xf32>
    %65 = vector.broadcast %64 : vector<1x128xf32> to vector<32x128xf32>
    %66 = vector.broadcast %62 : vector<32x1xf32> to vector<32x128xf32>
    %67 = arith.mulf %66, %65 : vector<32x128xf32>
    %cst_31 = arith.constant 1.000000e+00 : f32
    %68 = vector.broadcast %cst_31 : f32 to vector<32x128xf32>
    %69 = arith.addf %67, %68 : vector<32x128xf32>
    %70 = arith.mulf %61, %69 : vector<32x128xf32>
    %c0_32 = arith.constant 0 : index
    %c7 = arith.constant 7 : index
    %71 = vector.load %arg2[%c0_32, %c7] : memref<32x16xf32, #tpu.memory_space<vmem>>, vector<32x1xf32>
    %c7_33 = arith.constant 7 : index
    %c0_34 = arith.constant 0 : index
    %72 = vector.load %arg5[%c7_33, %c0_34] : memref<48x128xf32, #tpu.memory_space<vmem>>, vector<1x128xf32>
    %73 = vector.shape_cast %72 : vector<1x128xf32> to vector<1x128xf32>
    %74 = vector.broadcast %73 : vector<1x128xf32> to vector<32x128xf32>
    %75 = vector.broadcast %71 : vector<32x1xf32> to vector<32x128xf32>
    %76 = arith.mulf %75, %74 : vector<32x128xf32>
    %cst_35 = arith.constant 1.000000e+00 : f32
    %77 = vector.broadcast %cst_35 : f32 to vector<32x128xf32>
    %78 = arith.addf %76, %77 : vector<32x128xf32>
    %79 = arith.mulf %70, %78 : vector<32x128xf32>
    %c0_36 = arith.constant 0 : index
    %c8 = arith.constant 8 : index
    %80 = vector.load %arg2[%c0_36, %c8] : memref<32x16xf32, #tpu.memory_space<vmem>>, vector<32x1xf32>
    %c8_37 = arith.constant 8 : index
    %c0_38 = arith.constant 0 : index
    %81 = vector.load %arg5[%c8_37, %c0_38] : memref<48x128xf32, #tpu.memory_space<vmem>>, vector<1x128xf32>
    %82 = vector.shape_cast %81 : vector<1x128xf32> to vector<1x128xf32>
    %83 = vector.broadcast %82 : vector<1x128xf32> to vector<32x128xf32>
    %84 = vector.broadcast %80 : vector<32x1xf32> to vector<32x128xf32>
    %85 = arith.mulf %84, %83 : vector<32x128xf32>
    %cst_39 = arith.constant 1.000000e+00 : f32
    %86 = vector.broadcast %cst_39 : f32 to vector<32x128xf32>
    %87 = arith.addf %85, %86 : vector<32x128xf32>
    %88 = arith.mulf %79, %87 : vector<32x128xf32>
    %c0_40 = arith.constant 0 : index
    %c9 = arith.constant 9 : index
    %89 = vector.load %arg2[%c0_40, %c9] : memref<32x16xf32, #tpu.memory_space<vmem>>, vector<32x1xf32>
    %c9_41 = arith.constant 9 : index
    %c0_42 = arith.constant 0 : index
    %90 = vector.load %arg5[%c9_41, %c0_42] : memref<48x128xf32, #tpu.memory_space<vmem>>, vector<1x128xf32>
    %91 = vector.shape_cast %90 : vector<1x128xf32> to vector<1x128xf32>
    %92 = vector.broadcast %91 : vector<1x128xf32> to vector<32x128xf32>
    %93 = vector.broadcast %89 : vector<32x1xf32> to vector<32x128xf32>
    %94 = arith.mulf %93, %92 : vector<32x128xf32>
    %cst_43 = arith.constant 1.000000e+00 : f32
    %95 = vector.broadcast %cst_43 : f32 to vector<32x128xf32>
    %96 = arith.addf %94, %95 : vector<32x128xf32>
    %97 = arith.mulf %88, %96 : vector<32x128xf32>
    %c0_44 = arith.constant 0 : index
    %c10 = arith.constant 10 : index
    %98 = vector.load %arg2[%c0_44, %c10] : memref<32x16xf32, #tpu.memory_space<vmem>>, vector<32x1xf32>
    %c10_45 = arith.constant 10 : index
    %c0_46 = arith.constant 0 : index
    %99 = vector.load %arg5[%c10_45, %c0_46] : memref<48x128xf32, #tpu.memory_space<vmem>>, vector<1x128xf32>
    %100 = vector.shape_cast %99 : vector<1x128xf32> to vector<1x128xf32>
    %101 = vector.broadcast %100 : vector<1x128xf32> to vector<32x128xf32>
    %102 = vector.broadcast %98 : vector<32x1xf32> to vector<32x128xf32>
    %103 = arith.mulf %102, %101 : vector<32x128xf32>
    %cst_47 = arith.constant 1.000000e+00 : f32
    %104 = vector.broadcast %cst_47 : f32 to vector<32x128xf32>
    %105 = arith.addf %103, %104 : vector<32x128xf32>
    %106 = arith.mulf %97, %105 : vector<32x128xf32>
    %c0_48 = arith.constant 0 : index
    %c11 = arith.constant 11 : index
    %107 = vector.load %arg2[%c0_48, %c11] : memref<32x16xf32, #tpu.memory_space<vmem>>, vector<32x1xf32>
    %c11_49 = arith.constant 11 : index
    %c0_50 = arith.constant 0 : index
    %108 = vector.load %arg5[%c11_49, %c0_50] : memref<48x128xf32, #tpu.memory_space<vmem>>, vector<1x128xf32>
    %109 = vector.shape_cast %108 : vector<1x128xf32> to vector<1x128xf32>
    %110 = vector.broadcast %109 : vector<1x128xf32> to vector<32x128xf32>
    %111 = vector.broadcast %107 : vector<32x1xf32> to vector<32x128xf32>
    %112 = arith.mulf %111, %110 : vector<32x128xf32>
    %cst_51 = arith.constant 1.000000e+00 : f32
    %113 = vector.broadcast %cst_51 : f32 to vector<32x128xf32>
    %114 = arith.addf %112, %113 : vector<32x128xf32>
    %115 = arith.mulf %106, %114 : vector<32x128xf32>
    %c0_52 = arith.constant 0 : index
    %c12 = arith.constant 12 : index
    %116 = vector.load %arg2[%c0_52, %c12] : memref<32x16xf32, #tpu.memory_space<vmem>>, vector<32x1xf32>
    %c12_53 = arith.constant 12 : index
    %c0_54 = arith.constant 0 : index
    %117 = vector.load %arg5[%c12_53, %c0_54] : memref<48x128xf32, #tpu.memory_space<vmem>>, vector<1x128xf32>
    %118 = vector.shape_cast %117 : vector<1x128xf32> to vector<1x128xf32>
    %119 = vector.broadcast %118 : vector<1x128xf32> to vector<32x128xf32>
    %120 = vector.broadcast %116 : vector<32x1xf32> to vector<32x128xf32>
    %121 = arith.mulf %120, %119 : vector<32x128xf32>
    %cst_55 = arith.constant 1.000000e+00 : f32
    %122 = vector.broadcast %cst_55 : f32 to vector<32x128xf32>
    %123 = arith.addf %121, %122 : vector<32x128xf32>
    %124 = arith.mulf %115, %123 : vector<32x128xf32>
    %c0_56 = arith.constant 0 : index
    %c13 = arith.constant 13 : index
    %125 = vector.load %arg2[%c0_56, %c13] : memref<32x16xf32, #tpu.memory_space<vmem>>, vector<32x1xf32>
    %c13_57 = arith.constant 13 : index
    %c0_58 = arith.constant 0 : index
    %126 = vector.load %arg5[%c13_57, %c0_58] : memref<48x128xf32, #tpu.memory_space<vmem>>, vector<1x128xf32>
    %127 = vector.shape_cast %126 : vector<1x128xf32> to vector<1x128xf32>
    %128 = vector.broadcast %127 : vector<1x128xf32> to vector<32x128xf32>
    %129 = vector.broadcast %125 : vector<32x1xf32> to vector<32x128xf32>
    %130 = arith.mulf %129, %128 : vector<32x128xf32>
    %cst_59 = arith.constant 1.000000e+00 : f32
    %131 = vector.broadcast %cst_59 : f32 to vector<32x128xf32>
    %132 = arith.addf %130, %131 : vector<32x128xf32>
    %133 = arith.mulf %124, %132 : vector<32x128xf32>
    %c0_60 = arith.constant 0 : index
    %c14 = arith.constant 14 : index
    %134 = vector.load %arg2[%c0_60, %c14] : memref<32x16xf32, #tpu.memory_space<vmem>>, vector<32x1xf32>
    %c14_61 = arith.constant 14 : index
    %c0_62 = arith.constant 0 : index
    %135 = vector.load %arg5[%c14_61, %c0_62] : memref<48x128xf32, #tpu.memory_space<vmem>>, vector<1x128xf32>
    %136 = vector.shape_cast %135 : vector<1x128xf32> to vector<1x128xf32>
    %137 = vector.broadcast %136 : vector<1x128xf32> to vector<32x128xf32>
    %138 = vector.broadcast %134 : vector<32x1xf32> to vector<32x128xf32>
    %139 = arith.mulf %138, %137 : vector<32x128xf32>
    %cst_63 = arith.constant 1.000000e+00 : f32
    %140 = vector.broadcast %cst_63 : f32 to vector<32x128xf32>
    %141 = arith.addf %139, %140 : vector<32x128xf32>
    %142 = arith.mulf %133, %141 : vector<32x128xf32>
    %c0_64 = arith.constant 0 : index
    %c15 = arith.constant 15 : index
    %143 = vector.load %arg2[%c0_64, %c15] : memref<32x16xf32, #tpu.memory_space<vmem>>, vector<32x1xf32>
    %c15_65 = arith.constant 15 : index
    %c0_66 = arith.constant 0 : index
    %144 = vector.load %arg5[%c15_65, %c0_66] : memref<48x128xf32, #tpu.memory_space<vmem>>, vector<1x128xf32>
    %145 = vector.shape_cast %144 : vector<1x128xf32> to vector<1x128xf32>
    %146 = vector.broadcast %145 : vector<1x128xf32> to vector<32x128xf32>
    %147 = vector.broadcast %143 : vector<32x1xf32> to vector<32x128xf32>
    %148 = arith.mulf %147, %146 : vector<32x128xf32>
    %cst_67 = arith.constant 1.000000e+00 : f32
    %149 = vector.broadcast %cst_67 : f32 to vector<32x128xf32>
    %150 = arith.addf %148, %149 : vector<32x128xf32>
    %151 = arith.mulf %142, %150 : vector<32x128xf32>
    %cst_68 = arith.constant dense<0.000000e+00> : vector<128xf32>
    %152 = vector.multi_reduction <add>, %151, %cst_68 [0] : vector<32x128xf32> to vector<128xf32>
    %153 = vector.shape_cast %152 : vector<128xf32> to vector<1x128xf32>
    %c0_69 = arith.constant 0 : index
    %154 = arith.index_cast %1 : i32 to index
    %155 = vector.load %arg4[%c0_69, %154] : memref<1x128xf32, #tpu.memory_space<vmem>>, vector<1x128xf32>
    tpu.vector_store %arg4[%c0_69, %154], %153 {strides = array<i32>} : memref<1x128xf32, #tpu.memory_space<vmem>>, vector<1x128xf32>,
    %c1_i32 = arith.constant 1 : i32
    return
  }
  func.func @transform_0(%arg0: i32) -> (i32, i32) {
    %c0_i32 = arith.constant 0 : i32
    %c0_i32_0 = arith.constant 0 : i32
    return %arg0, %c0_i32 : i32, i32
  }
  func.func @transform_1(%arg0: i32) -> (i32, i32) {
    %c0_i32 = arith.constant 0 : i32
    %c0_i32_0 = arith.constant 0 : i32
    %c0_i32_1 = arith.constant 0 : i32
    return %c0_i32, %c0_i32_0 : i32, i32
  }
  func.func @transform_2(%arg0: i32) -> (i32, i32) {
    %c0_i32 = arith.constant 0 : i32
    %c0_i32_0 = arith.constant 0 : i32
    %c0_i32_1 = arith.constant 0 : i32
    return %c0_i32, %c0_i32_0 : i32, i32
  }
  func.func @transform_3(%arg0: i32) -> (i32, i32) {
    %c0_i32 = arith.constant 0 : i32
    %c0_i32_0 = arith.constant 0 : i32
    return %c0_i32, %arg0 : i32, i32
  }
}

</mosaic_0001>

<bundles_post_ra>
// kernel: tpu_custom_call.1
= control target key start
LH: loop header
LB: loop body
LE: loop exit
PB: predicated region body
PF: predicated region fallthrough
CT: control target
= control target key end

     0   :  { %v663_v2 = vmov 0   ;;  %s904_s0 = inlined_call_operand.vmem [shape: f32[128,16], index: 0, kind: input, shape index: {}]   ;;  %s905_s1 = inlined_call_operand.vmem [shape: f32[32,16], index: 1, kind: input, shape index: {}]   ;;  %s906_s2 = inlined_call_operand.vmem [shape: f32[32,1], index: 2, kind: input, shape index: {}]   ;;  %s907_s3 = inlined_call_operand.hbm [shape: f32[1,128], index: 3, kind: output, shape index: {}]  }
   0x1   :  { %v15_v0 = vld [vmem:[%s904_s0] sm:$0xff]  ;;  %602 = vset.pattern.permute.xlu1 %v663_v2  ;;  %v16_v3 = vld [vmem:[%s904_s0 + $0x8] sm:$0xff]  ;;  %v17_v5 = vld [vmem:[%s904_s0 + $0x10] sm:$0xff] }
   0x2   :  { %v706_v1 = vld [vmem:[%s905_s1] sm:$0xff]  ;;  %31 = vxpose.xlu0.b32.start [1/16] (narrow) %v15_v0, 16  ;;  %v715_v4 = vld [vmem:[%s905_s1 + $0x8] sm:$0xff]  ;;  %v724_v6 = vld [vmem:[%s905_s1 + $0x10] sm:$0xff] }
   0x3   :  { %74 = vperm.xlu1 %602, %v706_v1  }
   0x6   :  { %32 = vxpose.xlu0.b32.cont [2/16] (narrow) %v16_v3, 16 }
   0x7   :  { %79 = vperm.xlu1 %602, %v715_v4  }
   0x8   :  { %8 = vsyncpa [#allocation4], 0  ;;  %v18_v7 = vld [vmem:[%s904_s0 + $0x18] sm:$0xff]  ;;  %v19_v9 = vld [vmem:[%s904_s0 + $0x20] sm:$0xff]  ;;  %v664_v18 = vmov 1   ;;  %v665_v24 = vmov 2  }
   0x9   :  { %v733_v8 = vld [vmem:[%s905_s1 + $0x18] sm:$0xff]  ;;  %v96_v10 = vld [vmem:[%s906_s2] sm:$0xff]  ;;  %v20_v11 = vld [vmem:[%s904_s0 + $0x28] sm:$0xff]  ;;  %v666_v27 = vmov 3   ;;  %v667_v28 = vmov 4   ;;  %v668_v29 = vmov 5  }
   0xa   :  { %33 = vxpose.xlu0.b32.cont [3/16] (narrow) %v17_v5, 16  ;;  %v97_v12 = vld [vmem:[%s906_s2 + $0x8] sm:$0xff]  ;;  %v21_v13 = vld [vmem:[%s904_s0 + $0x30] sm:$0xff]  ;;  %v22_v15 = vld [vmem:[%s904_s0 + $0x38] sm:$0xff]  ;;  %v669_v30 = vmov 6   ;;  %v670_v31 = vmov 7  }
   0xb   :  { %84 = vperm.xlu1 %602, %v724_v6   ;;  %v98_v14 = vld [vmem:[%s906_s2 + $0x10] sm:$0xff]  ;;  %v99_v16 = vld [vmem:[%s906_s2 + $0x18] sm:$0xff]  ;;  %v23_v17 = vld [vmem:[%s904_s0 + $0x40] sm:$0xff]  ;;  %v671_v32 = vmov 8   ;;  %v672_v36 = vmov 9   ;;  %v673_v40 = vmov 10  }
   0xc   :  { %v24_v19 = vld [vmem:[%s904_s0 + $0x48] sm:$0xff]  ;;  %v25_v20 = vld [vmem:[%s904_s0 + $0x50] sm:$0xff]  ;;  %v26_v21 = vld [vmem:[%s904_s0 + $0x58] sm:$0xff]  ;;  %v674_v42 = vmov 11   ;;  %v675_v46 = vmov 12   ;;  %v676_v48 = vmov 13  }
   0xd   :  { %v27_v22 = vld [vmem:[%s904_s0 + $0x60] sm:$0xff]  ;;  %v28_v23 = vld [vmem:[%s904_s0 + $0x68] sm:$0xff]  ;;  %v29_v25 = vld [vmem:[%s904_s0 + $0x70] sm:$0xff]  ;;  %v677_v57 = vmov 14   ;;  %v678_v0 = vmov 15  }
   0xe   :  { %34 = vxpose.xlu0.b32.cont [4/16] (narrow) %v18_v7, 16  ;;  %v30_v26 = vld [vmem:[%s904_s0 + $0x78] sm:$0xff]  ;;  %s679_s0 = smov [#allocation3]  }
   0xf   :  { %89 = vperm.xlu1 %602, %v733_v8   ;;  %s575_s4 = sshll.u32 %s679_s0, 4  ;;  %s576_s4 = int_to_ptr.vmem [resolvable:$true] %s575_s4 }
  0x10   :  { %s639_s5 = scalar_lea.vmem %s576_s4, 16  ;;  %s643_s6 = scalar_lea.vmem %s576_s4, 32 }
  0x11   :  { %p640_p0 = scmp.ne.s32.totalorder %s576_s4, %s639_s5  ;;  %p644_p1 = scmp.lt.s32.totalorder %s576_s4, %s576_s4 }
  0x12   :  { %35 = vxpose.xlu0.b32.cont [5/16] (narrow) %v19_v9, 16  ;;  %p645_p2 = scmp.lt.s32.totalorder %s643_s6, %s639_s5 }
  0x13   :  { %102 = vperm.xlu1 %602, %v96_v10  }
  0x14   :  { %p646_p3 = por %p645_p2, %p644_p1 }
  0x16   :  { %36 = vxpose.xlu0.b32.cont [6/16] (narrow) %v20_v11, 16  ;;  %p647_p4 = pnand %p646_p3, %p640_p0 }
  0x17   :  { %107 = vperm.xlu1 %602, %v97_v12  }
  0x1a   :  { %37 = vxpose.xlu0.b32.cont [7/16] (narrow) %v21_v13, 16 }
  0x1b   :  { %112 = vperm.xlu1 %602, %v98_v14  }
  0x1e   :  { %38 = vxpose.xlu0.b32.cont [8/16] (narrow) %v22_v15, 16 }
  0x1f   :  { %117 = vperm.xlu1 %602, %v99_v16  }
  0x22   :  { %39 = vxpose.xlu0.b32.cont [9/16] (narrow) %v23_v17, 16 }
  0x23   :  { %603 = vset.pattern.permute.xlu1 %v664_v18 }
  0x24   :  { %126 = vperm.xlu1 %603, %v706_v1  }
  0x26   :  { %40 = vxpose.xlu0.b32.cont [10/16] (narrow) %v24_v19, 16 }
  0x28   :  { %130 = vperm.xlu1 %603, %v715_v4  }
  0x2a   :  { %41 = vxpose.xlu0.b32.cont [11/16] (narrow) %v25_v20, 16 }
  0x2c   :  { %134 = vperm.xlu1 %603, %v724_v6  }
  0x2e   :  { %42 = vxpose.xlu0.b32.cont [12/16] (narrow) %v26_v21, 16 }
  0x30   :  { %138 = vperm.xlu1 %603, %v733_v8  }
  0x32   :  { %43 = vxpose.xlu0.b32.cont [13/16] (narrow) %v27_v22, 16 }
  0x34   :  { %604 = vset.pattern.permute.xlu1 %v665_v24 }
  0x35   :  { %155 = vperm.xlu1 %604, %v706_v1  }
  0x36   :  { %44 = vxpose.xlu0.b32.cont [14/16] (narrow) %v28_v23, 16 }
  0x39   :  { %159 = vperm.xlu1 %604, %v715_v4  }
  0x3a   :  { %45 = vxpose.xlu0.b32.cont [15/16] (narrow) %v29_v25, 16 }
  0x3d   :  { %163 = vperm.xlu1 %604, %v724_v6  }
  0x3e   :  { %46 = vxpose.xlu0.b32.end [16/16] (narrow) %v30_v26, 16 }
  0x41   :  { %167 = vperm.xlu1 %604, %v733_v8  }
  0x45   :  { %606 = vset.pattern.permute.xlu1 %v666_v27 }
  0x46   :  { %188 = vperm.xlu1 %606, %v715_v4  }
  0x4a   :  { %192 = vperm.xlu1 %606, %v724_v6  }
  0x4e   :  { %196 = vperm.xlu1 %606, %v733_v8  }
  0x52   :  { %607 = vset.pattern.permute.xlu1 %v667_v28 }
  0x53   :  { %213 = vperm.xlu1 %607, %v706_v1  }
  0x57   :  { %217 = vperm.xlu1 %607, %v715_v4  }
  0x5b   :  { %221 = vperm.xlu1 %607, %v724_v6  }
  0x5f   :  { %225 = vperm.xlu1 %607, %v733_v8  }
  0x63   :  { %608 = vset.pattern.permute.xlu1 %v668_v29 }
  0x64   :  { %242 = vperm.xlu1 %608, %v706_v1  }
  0x67   :  { %605 = vset.pattern.permute.xlu0 %v666_v27 }
  0x68   :  { %246 = vperm.xlu1 %608, %v715_v4   ;;  %184 = vperm.xlu0 %605, %v706_v1  }
  0x6c   :  { %250 = vperm.xlu1 %608, %v724_v6   ;;  %609 = vset.pattern.permute.xlu0 %v669_v30 }
  0x6d   :  { %271 = vperm.xlu0 %609, %v706_v1  }
  0x70   :  { %254 = vperm.xlu1 %608, %v733_v8  }
  0x71   :  { %283 = vperm.xlu0 %609, %v733_v8  }
  0x74   :  { %610 = vset.pattern.permute.xlu1 %v669_v30 }
  0x75   :  { %275 = vperm.xlu1 %610, %v715_v4   ;;  %612 = vset.pattern.permute.xlu0 %v670_v31 }
  0x76   :  { %304 = vperm.xlu0 %612, %v715_v4  }
  0x79   :  { %279 = vperm.xlu1 %610, %v724_v6  }
  0x7a   :  { %613 = vset.pattern.permute.xlu0 %v671_v32 }
  0x7b   :  { %329 = vperm.xlu0 %613, %v706_v1  }
  0x7d   :  { %611 = vset.pattern.permute.xlu1 %v670_v31 }
  0x7e   :  { %300 = vperm.xlu1 %611, %v706_v1  }
  0x7f   :  { %341 = vperm.xlu0 %613, %v733_v8  }
  0x82   :  { %308 = vperm.xlu1 %611, %v724_v6   ;;  %v75_v33 = vpop.permute.xlu1 %74  ;;  %v47_v34 = vpop.trf.xlu0 }
  0x83   :  { %v583_v35 = vadd.f32 -1.0, %v47_v34  ;;  %616 = vset.pattern.permute.xlu0 %v672_v36 }
  0x84   :  { %362 = vperm.xlu0 %616, %v715_v4  }
  0x85   :  { %65 = vst [vmem:[#allocation2] sm:$0xff] %v583_v35 }
  0x86   :  { %312 = vperm.xlu1 %611, %v733_v8   ;;  %v80_v37 = vpop.permute.xlu1 %79  ;;  %v48_v38 = vpop.trf.xlu0 }
  0x87   :  { %v584_v39 = vadd.f32 -1.0, %v48_v38 }
  0x88   :  { %618 = vset.pattern.permute.xlu0 %v673_v40 }
  0x89   :  { %391 = vperm.xlu0 %618, %v715_v4   ;;  %66 = vst [vmem:[#allocation2 + $0x8] sm:$0xff] %v584_v39 }
  0x8a   :  { %614 = vset.pattern.permute.xlu1 %v671_v32  ;;  %v85_v41 = vpop.permute.xlu1 %84 }
  0x8b   :  { %333 = vperm.xlu1 %614, %v715_v4  }
  0x8c   :  { %v71_v49 = vld [vmem:[#allocation2] ss:$0 sm:$0xff]  ;;  %v124_v53 = vld [vmem:[#allocation2 + $0x1] ss:$0 sm:$0xff]  ;;  %v153_v17 = vld [vmem:[#allocation2 + $0x2] ss:$0 sm:$0xff] }
  0x8d   :  { %621 = vset.pattern.permute.xlu0 %v674_v42  ;;  %v92_v55 = vmul.f32 %v75_v33, %v71_v49  ;;  %v93_v61 = vmul.f32 %v80_v37, %v71_v49  ;;  %v94_v7 = vmul.f32 %v85_v41, %v71_v49  ;;  %v182_v34 = vld [vmem:[#allocation2 + $0x3] ss:$0 sm:$0xff] }
  0x8e   :  { %v90_v43 = vpop.permute.xlu1 %89  ;;  %416 = vperm.xlu0 %621, %v706_v1  }
  0x8f   :  { %337 = vperm.xlu1 %614, %v724_v6   ;;  %v95_v50 = vmul.f32 %v90_v43, %v71_v49 }
  0x92   :  { %v103_v44 = vpop.permute.xlu1 %102  ;;  %424 = vperm.xlu0 %621, %v724_v6  }
  0x93   :  { %615 = vset.pattern.permute.xlu1 %v672_v36  ;;  %v120_v58 = vadd.f32 %v103_v44, %v92_v55 }
  0x94   :  { %358 = vperm.xlu1 %615, %v706_v1  }
  0x96   :  { %v108_v45 = vpop.permute.xlu1 %107  ;;  %625 = vset.pattern.permute.xlu0 %v675_v46 }
  0x97   :  { %449 = vperm.xlu0 %625, %v715_v4   ;;  %v121_v2 = vadd.f32 %v108_v45, %v93_v61 }
  0x98   :  { %366 = vperm.xlu1 %615, %v724_v6  }
  0x9a   :  { %v113_v47 = vpop.permute.xlu1 %112 }
  0x9b   :  { %628 = vset.pattern.permute.xlu0 %v676_v48  ;;  %v122_v11 = vadd.f32 %v113_v47, %v94_v7 }
  0x9c   :  { %617 = vset.pattern.permute.xlu1 %v673_v40  ;;  %474 = vperm.xlu0 %628, %v706_v1  }
  0x9d   :  { %387 = vperm.xlu1 %617, %v706_v1  }
  0x9e   :  { %v118_v51 = vpop.permute.xlu1 %117 }
  0x9f   :  { %v123_v52 = vadd.f32 %v118_v51, %v95_v50 }
  0xa0   :  { %482 = vperm.xlu0 %628, %v724_v6  }
  0xa1   :  { %619 = vset.pattern.permute.xlu1 %v672_v36 }
  0xa2   :  { %370 = vperm.xlu1 %619, %v733_v8  }
  0xa3   :  { %v127_v54 = vpop.permute.xlu1 %126 }
  0xa4   :  { %v141_v56 = vmul.f32 %v127_v54, %v124_v53  ;;  %632 = vset.pattern.permute.xlu0 %v677_v57 }
  0xa5   :  { %507 = vperm.xlu0 %632, %v715_v4  }
  0xa6   :  { %v145_v59 = vadd.f32 1.0, %v141_v56  ;;  %620 = vset.pattern.permute.xlu1 %v673_v40 }
  0xa7   :  { %395 = vperm.xlu1 %620, %v724_v6   ;;  %v131_v60 = vpop.permute.xlu1 %130 }
  0xa8   :  { %v149_v62 = vmul.f32 %v145_v59, %v120_v58  ;;  %v142_v63 = vmul.f32 %v131_v60, %v124_v53 }
  0xa9   :  { %635 = vset.pattern.permute.xlu0 %v678_v0 }
  0xaa   :  { %v146_v3 = vadd.f32 1.0, %v142_v63  ;;  %532 = vperm.xlu0 %635, %v706_v1   ;;  %v240_v63 = vld [vmem:[#allocation2 + $0x5] ss:$0 sm:$0xff] }
  0xab   :  { %622 = vset.pattern.permute.xlu1 %v674_v42  ;;  %v135_v5 = vpop.permute.xlu1 %134 }
  0xac   :  { %v150_v9 = vmul.f32 %v146_v3, %v121_v2  ;;  %v143_v10 = vmul.f32 %v135_v5, %v124_v53  ;;  %420 = vperm.xlu1 %622, %v715_v4  }
  0xae   :  { %v147_v12 = vadd.f32 1.0, %v143_v10  ;;  %540 = vperm.xlu0 %635, %v724_v6  }
  0xaf   :  { %v139_v13 = vpop.permute.xlu1 %138 }
  0xb0   :  { %v151_v14 = vmul.f32 %v147_v12, %v122_v11  ;;  %v144_v15 = vmul.f32 %v139_v13, %v124_v53  ;;  %623 = vset.pattern.permute.xlu1 %v673_v40 }
  0xb1   :  { %399 = vperm.xlu1 %623, %v733_v8  }
  0xb2   :  { %v148_v16 = vadd.f32 1.0, %v144_v15 }
  0xb4   :  { %v152_v18 = vmul.f32 %v148_v16, %v123_v52  ;;  %v156_v19 = vpop.permute.xlu1 %155 }
  0xb5   :  { %v170_v20 = vmul.f32 %v156_v19, %v153_v17  ;;  %624 = vset.pattern.permute.xlu1 %v675_v46 }
  0xb6   :  { %445 = vperm.xlu1 %624, %v706_v1  }
  0xb7   :  { %v174_v21 = vadd.f32 1.0, %v170_v20 }
  0xb8   :  { %v160_v22 = vpop.permute.xlu1 %159 }
  0xb9   :  { %v845_v23 = vmul.f32 %v174_v21, %v149_v62  ;;  %v171_v24 = vmul.f32 %v160_v22, %v153_v17  ;;  %v269_v22 = vld [vmem:[#allocation2 + $0x6] ss:$0 sm:$0xff] }
  0xba   :  { %626 = vset.pattern.permute.xlu1 %v674_v42 }
  0xbb   :  { %v175_v25 = vadd.f32 1.0, %v171_v24  ;;  %428 = vperm.xlu1 %626, %v733_v8  }
  0xbc   :  { %v164_v26 = vpop.permute.xlu1 %163 }
  0xbd   :  { %v179_v27 = vmul.f32 %v175_v25, %v150_v9  ;;  %v172_v28 = vmul.f32 %v164_v26, %v153_v17 }
  0xbf   :  { %v176_v29 = vadd.f32 1.0, %v172_v28  ;;  %627 = vset.pattern.permute.xlu1 %v675_v46 }
  0xc0   :  { %453 = vperm.xlu1 %627, %v724_v6   ;;  %v168_v30 = vpop.permute.xlu1 %167 }
  0xc1   :  { %v180_v31 = vmul.f32 %v176_v29, %v151_v14  ;;  %v173_v32 = vmul.f32 %v168_v30, %v153_v17 }
  0xc3   :  { %v177_v33 = vadd.f32 1.0, %v173_v32 }
  0xc4   :  { %629 = vset.pattern.permute.xlu1 %v676_v48 }
  0xc5   :  { %v181_v35 = vmul.f32 %v177_v33, %v152_v18  ;;  %478 = vperm.xlu1 %629, %v715_v4   ;;  %v189_v36 = vpop.permute.xlu1 %188 }
  0xc6   :  { %v200_v37 = vmul.f32 %v189_v36, %v182_v34 }
  0xc8   :  { %v204_v38 = vadd.f32 1.0, %v200_v37 }
  0xc9   :  { %630 = vset.pattern.permute.xlu1 %v675_v46  ;;  %v193_v39 = vpop.permute.xlu1 %192  ;;  %v211_v46 = vld [vmem:[#allocation2 + $0x4] ss:$0 sm:$0xff] }
  0xca   :  { %v208_v40 = vmul.f32 %v204_v38, %v179_v27  ;;  %v201_v41 = vmul.f32 %v193_v39, %v182_v34  ;;  %457 = vperm.xlu1 %630, %v733_v8  }
  0xcc   :  { %v205_v42 = vadd.f32 1.0, %v201_v41 }
  0xcd   :  { %v197_v43 = vpop.permute.xlu1 %196 }
  0xce   :  { %v209_v44 = vmul.f32 %v205_v42, %v180_v31  ;;  %v202_v45 = vmul.f32 %v197_v43, %v182_v34  ;;  %631 = vset.pattern.permute.xlu1 %v677_v57 }
  0xcf   :  { %503 = vperm.xlu1 %631, %v706_v1  }
  0xd0   :  { %v206_v47 = vadd.f32 1.0, %v202_v45 }
  0xd2   :  { %v210_v49 = vmul.f32 %v206_v47, %v181_v35  ;;  %v214_v50 = vpop.permute.xlu1 %213 }
  0xd3   :  { %633 = vset.pattern.permute.xlu1 %v676_v48  ;;  %v228_v3 = vmul.f32 %v214_v50, %v211_v46 }
  0xd4   :  { %486 = vperm.xlu1 %633, %v733_v8  }
  0xd5   :  { %v232_v12 = vadd.f32 1.0, %v228_v3 }
  0xd6   :  { %v218_v51 = vpop.permute.xlu1 %217 }
  0xd7   :  { %v229_v52 = vmul.f32 %v218_v51, %v211_v46 }
  0xd8   :  { %634 = vset.pattern.permute.xlu1 %v677_v57 }
  0xd9   :  { %v233_v53 = vadd.f32 1.0, %v229_v52  ;;  %511 = vperm.xlu1 %634, %v724_v6  }
  0xda   :  { %v222_v54 = vpop.permute.xlu1 %221 }
  0xdb   :  { %v237_v55 = vmul.f32 %v233_v53, %v208_v40  ;;  %v230_v56 = vmul.f32 %v222_v54, %v211_v46 }
  0xdd   :  { %v234_v58 = vadd.f32 1.0, %v230_v56  ;;  %636 = vset.pattern.permute.xlu1 %v678_v0 }
  0xde   :  { %536 = vperm.xlu1 %636, %v715_v4   ;;  %v226_v1 = vpop.permute.xlu1 %225 }
  0xdf   :  { %v238_v48 = vmul.f32 %v234_v58, %v209_v44  ;;  %v231_v59 = vmul.f32 %v226_v1, %v211_v46 }
  0xe1   :  { %v235_v60 = vadd.f32 1.0, %v231_v59 }
  0xe2   :  { %637 = vset.pattern.permute.xlu1 %v677_v57 }
  0xe3   :  { %v239_v61 = vmul.f32 %v235_v60, %v210_v49  ;;  %515 = vperm.xlu1 %637, %v733_v8   ;;  %v243_v62 = vpop.permute.xlu1 %242 }
  0xe4   :  { %v257_v4 = vmul.f32 %v243_v62, %v240_v63 }
  0xe6   :  { %v261_v15 = vadd.f32 1.0, %v257_v4 }
  0xe7   :  { %638 = vset.pattern.permute.xlu1 %v678_v0  ;;  %v247_v6 = vpop.permute.xlu1 %246  ;;  %v185_v2 = vpop.permute.xlu0 %184 }
  0xe8   :  { %v258_v5 = vmul.f32 %v247_v6, %v240_v63  ;;  %v199_v7 = vmul.f32 %v185_v2, %v182_v34  ;;  %544 = vperm.xlu1 %638, %v733_v8   ;;  %v298_v34 = vld [vmem:[#allocation2 + $0x7] ss:$0 sm:$0xff] }
  0xea   :  { %v262_v9 = vadd.f32 1.0, %v258_v5  ;;  %v203_v10 = vadd.f32 1.0, %v199_v7 }
  0xeb   :  { %v251_v11 = vpop.permute.xlu1 %250 }
  0xec   :  { %v266_v57 = vmul.f32 %v262_v9, %v237_v55  ;;  %v207_v13 = vmul.f32 %v203_v10, %v845_v23  ;;  %v259_v14 = vmul.f32 %v251_v11, %v240_v63  ;;  %v272_v25 = vpop.permute.xlu0 %271 }
  0xed   :  { %v286_v28 = vmul.f32 %v272_v25, %v269_v22 }
  0xee   :  { %v236_v16 = vmul.f32 %v232_v12, %v207_v13  ;;  %v263_v17 = vadd.f32 1.0, %v259_v14  ;;  %v327_v12 = vld [vmem:[#allocation2 + $0x8] ss:$0 sm:$0xff]  ;;  %v356_v14 = vld [vmem:[#allocation2 + $0x9] ss:$0 sm:$0xff] }
  0xef   :  { %v255_v0 = vpop.permute.xlu1 %254  ;;  %v290_v32 = vadd.f32 1.0, %v286_v28 }
  0xf0   :  { %v267_v18 = vmul.f32 %v263_v17, %v238_v48  ;;  %v265_v19 = vmul.f32 %v261_v15, %v236_v16  ;;  %v260_v20 = vmul.f32 %v255_v0, %v240_v63  ;;  %v284_v33 = vpop.permute.xlu0 %283 }
  0xf1   :  { %v289_v39 = vmul.f32 %v284_v33, %v269_v22 }
  0xf2   :  { %v264_v21 = vadd.f32 1.0, %v260_v20  ;;  %v294_v38 = vmul.f32 %v290_v32, %v265_v19  ;;  %v385_v20 = vld [vmem:[#allocation2 + $0xa] ss:$0 sm:$0xff] }
  0xf3   :  { %v293_v44 = vadd.f32 1.0, %v289_v39 }
  0xf4   :  { %v268_v24 = vmul.f32 %v264_v21, %v239_v61  ;;  %v276_v8 = vpop.permute.xlu1 %275 }
  0xf5   :  { %v287_v26 = vmul.f32 %v276_v8, %v269_v22  ;;  %v305_v56 = vpop.permute.xlu0 %304 }
  0xf6   :  { %v297_v46 = vmul.f32 %v293_v44, %v268_v24  ;;  %v316_v11 = vmul.f32 %v305_v56, %v298_v34 }
  0xf7   :  { %v291_v27 = vadd.f32 1.0, %v287_v26  ;;  %v880_v26 = vld [vmem:[#allocation2 + $0xb] ss:$0 sm:$0xff] }
  0xf8   :  { %v280_v29 = vpop.permute.xlu1 %279  ;;  %v320_v16 = vadd.f32 1.0, %v316_v11 }
  0xf9   :  { %v295_v30 = vmul.f32 %v291_v27, %v266_v57  ;;  %v288_v31 = vmul.f32 %v280_v29, %v269_v22 }
  0xfa   :  { %v330_v1 = vpop.permute.xlu0 %329 }
  0xfb   :  { %v292_v23 = vadd.f32 1.0, %v288_v31  ;;  %v344_v17 = vmul.f32 %v330_v1, %v327_v12  ;;  %v324_v24 = vmul.f32 %v320_v16, %v295_v30  ;;  %v501_v16 = vld [vmem:[#allocation2 + $0xe] ss:$0 sm:$0xff] }
  0xfd   :  { %v296_v35 = vmul.f32 %v292_v23, %v267_v18  ;;  %v301_v36 = vpop.permute.xlu1 %300  ;;  %v348_v25 = vadd.f32 1.0, %v344_v17 }
  0xfe   :  { %v315_v37 = vmul.f32 %v301_v36, %v298_v34  ;;  %v870_v59 = vpop.permute.xlu0 %341 }
 0x100   :  { %v319_v40 = vadd.f32 1.0, %v315_v37 }
 0x101   :  { %v309_v41 = vpop.permute.xlu1 %308 }
 0x102   :  { %v323_v42 = vmul.f32 %v319_v40, %v294_v38  ;;  %v317_v43 = vmul.f32 %v309_v41, %v298_v34  ;;  %v443_v38 = vld [vmem:[#allocation2 + $0xc] ss:$0 sm:$0xff] }
 0x103   :  { %v363_v61 = vpop.permute.xlu0 %362 }
 0x104   :  { %v321_v45 = vadd.f32 1.0, %v317_v43  ;;  %v374_v18 = vmul.f32 %v363_v61, %v356_v14  ;;  %v352_v36 = vmul.f32 %v348_v25, %v323_v42  ;;  %v472_v42 = vld [vmem:[#allocation2 + $0xd] ss:$0 sm:$0xff] }
 0x105   :  { %v313_v47 = vpop.permute.xlu1 %312 }
 0x106   :  { %v325_v49 = vmul.f32 %v321_v45, %v296_v35  ;;  %v318_v50 = vmul.f32 %v313_v47, %v298_v34  ;;  %v378_v31 = vadd.f32 1.0, %v374_v18 }
 0x108   :  { %v322_v51 = vadd.f32 1.0, %v318_v50  ;;  %v392_v63 = vpop.permute.xlu0 %391 }
 0x109   :  { %v403_v23 = vmul.f32 %v392_v63, %v385_v20 }
 0x10a   :  { %v868_v52 = vmul.f32 %v322_v51, %v297_v46  ;;  %v334_v53 = vpop.permute.xlu1 %333 }
 0x10b   :  { %v345_v13 = vmul.f32 %v334_v53, %v327_v12  ;;  %v407_v44 = vadd.f32 1.0, %v403_v23 }
 0x10d   :  { %v417_v2 = vpop.permute.xlu0 %416  ;;  %v349_v0 = vadd.f32 1.0, %v345_v13 }
 0x10e   :  { %v338_v54 = vpop.permute.xlu1 %337  ;;  %v431_v35 = vmul.f32 %v417_v2, %v880_v26 }
 0x10f   :  { %v346_v19 = vmul.f32 %v338_v54, %v327_v12  ;;  %v353_v29 = vmul.f32 %v349_v0, %v324_v24 }
 0x110   :  { %v435_v53 = vadd.f32 1.0, %v431_v35 }
 0x111   :  { %v425_v7 = vpop.permute.xlu0 %424  ;;  %v350_v32 = vadd.f32 1.0, %v346_v19  ;;  %v382_v43 = vmul.f32 %v378_v31, %v353_v29 }
 0x112   :  { %v433_v45 = vmul.f32 %v425_v7, %v880_v26  ;;  %v347_v7 = vmul.f32 %v870_v59, %v327_v12 }
 0x113   :  { %v359_v55 = vpop.permute.xlu1 %358  ;;  %v354_v47 = vmul.f32 %v350_v32, %v325_v49 }
 0x114   :  { %v373_v21 = vmul.f32 %v359_v55, %v356_v14 }
 0x116   :  { %v450_v9 = vpop.permute.xlu0 %449  ;;  %v377_v33 = vadd.f32 1.0, %v373_v21 }
 0x117   :  { %v367_v58 = vpop.permute.xlu1 %366  ;;  %v461_v54 = vmul.f32 %v450_v9, %v443_v38 }
 0x118   :  { %v375_v27 = vmul.f32 %v367_v58, %v356_v14  ;;  %v381_v50 = vmul.f32 %v377_v33, %v352_v36 }
 0x119   :  { %v465_v49 = vadd.f32 1.0, %v461_v54 }
 0x11a   :  { %v379_v37 = vadd.f32 1.0, %v375_v27 }
 0x11b   :  { %v475_v57 = vpop.permute.xlu0 %474 }
 0x11c   :  { %v388_v48 = vpop.permute.xlu1 %387  ;;  %v383_v55 = vmul.f32 %v379_v37, %v354_v47  ;;  %v489_v13 = vmul.f32 %v475_v57, %v472_v42 }
 0x11d   :  { %v402_v28 = vmul.f32 %v388_v48, %v385_v20  ;;  %v411_v48 = vmul.f32 %v407_v44, %v382_v43 }
 0x11e   :  { %v493_v12 = vadd.f32 1.0, %v489_v13 }
 0x11f   :  { %v483_v22 = vpop.permute.xlu0 %482  ;;  %v406_v39 = vadd.f32 1.0, %v402_v28  ;;  %v351_v28 = vadd.f32 1.0, %v347_v7 }
 0x120   :  { %v491_v19 = vmul.f32 %v483_v22, %v472_v42 }
 0x121   :  { %v872_v60 = vpop.permute.xlu1 %370  ;;  %v410_v56 = vmul.f32 %v406_v39, %v381_v50  ;;  %v355_v37 = vmul.f32 %v351_v28, %v868_v52 }
 0x122   :  { %v376_v18 = vmul.f32 %v872_v60, %v356_v14  ;;  %v495_v14 = vadd.f32 1.0, %v491_v19 }
 0x123   :  { %v439_v17 = vmul.f32 %v435_v53, %v410_v56 }
 0x124   :  { %v508_v30 = vpop.permute.xlu0 %507  ;;  %v380_v33 = vadd.f32 1.0, %v376_v18 }
 0x125   :  { %v519_v29 = vmul.f32 %v508_v30, %v501_v16 }
 0x126   :  { %v396_v62 = vpop.permute.xlu1 %395 }
 0x127   :  { %v404_v34 = vmul.f32 %v396_v62, %v385_v20  ;;  %v437_v62 = vadd.f32 1.0, %v433_v45  ;;  %v523_v39 = vadd.f32 1.0, %v519_v29  ;;  %v384_v45 = vmul.f32 %v380_v33, %v355_v37 }
 0x129   :  { %v408_v46 = vadd.f32 1.0, %v404_v34 }
 0x12b   :  { %v421_v6 = vpop.permute.xlu1 %420  ;;  %v412_v63 = vmul.f32 %v408_v46, %v383_v55 }
 0x12c   :  { %v432_v40 = vmul.f32 %v421_v6, %v880_v26  ;;  %v533_v6 = vpop.permute.xlu0 %532 }
 0x12d   :  { %v441_v24 = vmul.f32 %v437_v62, %v412_v63 }
 0x12e   :  { %v436_v58 = vadd.f32 1.0, %v432_v40 }
 0x130   :  { %v874_v3 = vpop.permute.xlu1 %399  ;;  %v541_v57 = vpop.permute.xlu0 %540 }
 0x135   :  { %v446_v5 = vpop.permute.xlu1 %445 }
 0x136   :  { %v460_v51 = vmul.f32 %v446_v5, %v443_v38  ;;  %v440_v5 = vmul.f32 %v436_v58, %v411_v48 }
 0x138   :  { %v464_v2 = vadd.f32 1.0, %v460_v51  ;;  %v469_v23 = vmul.f32 %v465_v49, %v440_v5 }
 0x13a   :  { %v876_v4 = vpop.permute.xlu1 %428  ;;  %v468_v21 = vmul.f32 %v464_v2, %v439_v17 }
 0x13b   :  { %v434_v60 = vmul.f32 %v876_v4, %v880_v26 }
 0x13c   :  { %v497_v35 = vmul.f32 %v493_v12, %v468_v21 }
 0x13d   :  { %v438_v50 = vadd.f32 1.0, %v434_v60 }
 0x13f   :  { %v454_v10 = vpop.permute.xlu1 %453 }
 0x140   :  { %v462_v1 = vmul.f32 %v454_v10, %v443_v38  ;;  %v530_v10 = vld [vmem:[#allocation2 + $0xf] ss:$0 sm:$0xff] }
 0x141   :  { %v547_v34 = vmul.f32 %v533_v6, %v530_v10  ;;  %v549_v30 = vmul.f32 %v541_v57, %v530_v10 }
 0x142   :  { %v466_v9 = vadd.f32 1.0, %v462_v1 }
 0x143   :  { %v551_v47 = vadd.f32 1.0, %v547_v34  ;;  %v553_v53 = vadd.f32 1.0, %v549_v30 }
 0x144   :  { %v479_v15 = vpop.permute.xlu1 %478  ;;  %v470_v31 = vmul.f32 %v466_v9, %v441_v24 }
 0x145   :  { %v490_v11 = vmul.f32 %v479_v15, %v472_v42  ;;  %v405_v15 = vmul.f32 %v874_v3, %v385_v20 }
 0x146   :  { %v499_v43 = vmul.f32 %v495_v14, %v470_v31 }
 0x147   :  { %v494_v25 = vadd.f32 1.0, %v490_v11  ;;  %v409_v3 = vadd.f32 1.0, %v405_v15 }
 0x149   :  { %v878_v8 = vpop.permute.xlu1 %457  ;;  %v498_v22 = vmul.f32 %v494_v25, %v469_v23  ;;  %v413_v54 = vmul.f32 %v409_v3, %v384_v45 }
 0x14a   :  { %v463_v40 = vmul.f32 %v878_v8, %v443_v38 }
 0x14b   :  { %v527_v26 = vmul.f32 %v523_v39, %v498_v22  ;;  %v442_v48 = vmul.f32 %v438_v50, %v413_v54 }
 0x14c   :  { %v467_v55 = vadd.f32 1.0, %v463_v40 }
 0x14e   :  { %v504_v41 = vpop.permute.xlu1 %503  ;;  %v471_v63 = vmul.f32 %v467_v55, %v442_v48 }
 0x14f   :  { %v518_v0 = vmul.f32 %v504_v41, %v501_v16 }
 0x151   :  { %v522_v32 = vadd.f32 1.0, %v518_v0 }
 0x153   :  { %v487_v61 = vpop.permute.xlu1 %486  ;;  %v526_v41 = vmul.f32 %v522_v32, %v497_v35 }
 0x154   :  { %v492_v46 = vmul.f32 %v487_v61, %v472_v42 }
 0x155   :  { %v555_v52 = vmul.f32 %v551_v47, %v526_v41 }
 0x156   :  { %v496_v62 = vadd.f32 1.0, %v492_v46 }
 0x158   :  { %v512_v27 = vpop.permute.xlu1 %511  ;;  %v500_v7 = vmul.f32 %v496_v62, %v471_v63 }
 0x159   :  { %v520_v59 = vmul.f32 %v512_v27, %v501_v16 }
 0x15b   :  { %v524_v36 = vadd.f32 1.0, %v520_v59 }
 0x15d   :  { %v537_v20 = vpop.permute.xlu1 %536  ;;  %v528_v4 = vmul.f32 %v524_v36, %v499_v43 }
 0x15e   :  { %v548_v44 = vmul.f32 %v537_v20, %v530_v10 }
 0x15f   :  { %v557_v8 = vmul.f32 %v553_v53, %v528_v4 }
 0x160   :  { %v552_v51 = vadd.f32 1.0, %v548_v44 }
 0x162   :  { %v556_v56 = vmul.f32 %v552_v51, %v527_v26  ;;  %v516_v58 = vpop.permute.xlu1 %515 }
 0x163   :  { %v521_v1 = vmul.f32 %v516_v58, %v501_v16 }
 0x164   :  { %v559_v38 = vadd.f32 %v556_v56, %v555_v52 }
 0x165   :  { %v525_v6 = vadd.f32 1.0, %v521_v1 }
 0x166   :  { %v560_v2 = vadd.f32 %v559_v38, %v557_v8 }
 0x167   :  { %v545_v11 = vpop.permute.xlu1 %544  ;;  %v529_v61 = vmul.f32 %v525_v6, %v500_v7 }
 0x168   :  { %v550_v42 = vmul.f32 %v545_v11, %v530_v10 }
 0x16a   :  { %v554_v49 = vadd.f32 1.0, %v550_v42 }
 0x16c   :  { %v558_v13 = vmul.f32 %v554_v49, %v529_v61 }
 0x16e   :  { %v561_v5 = vadd.f32 %v560_v2, %v558_v13 }
 0x170   :  { %v562_v17 = vrot.slane %v561_v5, 4 }
 0x172   :  { %v563_v9 = vadd.f32 %v562_v17, %v561_v5 }
 0x174   :  { %v564_v0 = vrot.slane %v563_v9, 2 }
 0x176   :  { %v565_v18 = vadd.f32 %v564_v0, %v563_v9 }
 0x178   :  { %v566_v16 = vrot.slane %v565_v18, 1 }
 0x17a   :  { %v567_v19 = vadd.f32 %v566_v16, %v565_v18 }
 0x17c   :  { %568 = vst [vmem:[#allocation3] sm:$0x1] %v567_v19 }
 0x17d   :  { %650 = shalt.err (!%p647_p4)
}
 0x17e   :  { %s651_s8 = scalar_lea.hbm %s907_s3, 16 }
 0x17f   :  { %p652_p5 = scmp.ne.s32.totalorder %s907_s3, %s651_s8  ;;  %p655_p6 = scmp.lt.u32.totalorder %s651_s8, %s907_s3 }
 0x181   :  { %p657_p7 = pnand %p655_p6, %p652_p5 }
 0x183   :  { %660 = shalt.err (!%p657_p7)
}
 0x184   :  { %578 = dma.vmem_to_hbm [thread:$0]  %s576_s4, 16, %s907_s3, [#allocation4]  }
 0x185   :  { %661 = dma.done.wait [#allocation4], 16  }
 0x186   :  { %662 = vsyncadd [#allocation4], 4294967280 }
 0x187   :  { %582 = vsyncpa [#allocation4], 1 }

// kernel: tpu_custom_call.1
= control target key start
LH: loop header
LB: loop body
LE: loop exit
PB: predicated region body
PF: predicated region fallthrough
CT: control target
= control target key end

     0   :  { %v743_v2 = vmov 0   ;;  %s984_s0 = inlined_call_operand.vmem [shape: f32[128,16], index: 0, kind: input, shape index: {}]   ;;  %s985_s1 = inlined_call_operand.vmem [shape: f32[32,16], index: 1, kind: input, shape index: {}]   ;;  %s986_s2 = inlined_call_operand.vmem [shape: f32[32,1], index: 2, kind: input, shape index: {}]   ;;  %s987_s3 = inlined_call_operand.hbm [shape: f32[1,128], index: 3, kind: output, shape index: {}]  }
   0x1   :  { %v15_v0 = vld [vmem:[%s984_s0] sm:$0xff]  ;;  %682 = vset.pattern.permute.xlu1 %v743_v2  ;;  %v16_v3 = vld [vmem:[%s984_s0 + $0x8] sm:$0xff]  ;;  %v17_v5 = vld [vmem:[%s984_s0 + $0x10] sm:$0xff] }
   0x2   :  { %v786_v1 = vld [vmem:[%s985_s1] sm:$0xff]  ;;  %31 = vxpose.xlu0.b32.start [1/16] (narrow) %v15_v0, 16  ;;  %v795_v4 = vld [vmem:[%s985_s1 + $0x8] sm:$0xff]  ;;  %v804_v6 = vld [vmem:[%s985_s1 + $0x10] sm:$0xff] }
   0x3   :  { %78 = vperm.xlu1 %682, %v786_v1  }
   0x6   :  { %32 = vxpose.xlu0.b32.cont [2/16] (narrow) %v16_v3, 16 }
   0x7   :  { %83 = vperm.xlu1 %682, %v795_v4  }
   0x8   :  { %8 = vsyncpa [#allocation4], 0  ;;  %v18_v7 = vld [vmem:[%s984_s0 + $0x18] sm:$0xff]  ;;  %v19_v9 = vld [vmem:[%s984_s0 + $0x20] sm:$0xff]  ;;  %v744_v18 = vmov 1   ;;  %v745_v24 = vmov 2  }
   0x9   :  { %v813_v8 = vld [vmem:[%s985_s1 + $0x18] sm:$0xff]  ;;  %v100_v10 = vld [vmem:[%s986_s2] sm:$0xff]  ;;  %v20_v11 = vld [vmem:[%s984_s0 + $0x28] sm:$0xff]  ;;  %v746_v27 = vmov 3   ;;  %v747_v28 = vmov 4   ;;  %v748_v29 = vmov 5  }
   0xa   :  { %33 = vxpose.xlu0.b32.cont [3/16] (narrow) %v17_v5, 16  ;;  %v101_v12 = vld [vmem:[%s986_s2 + $0x8] sm:$0xff]  ;;  %v21_v13 = vld [vmem:[%s984_s0 + $0x30] sm:$0xff]  ;;  %v22_v15 = vld [vmem:[%s984_s0 + $0x38] sm:$0xff]  ;;  %v749_v30 = vmov 6   ;;  %v750_v31 = vmov 7  }
   0xb   :  { %88 = vperm.xlu1 %682, %v804_v6   ;;  %v102_v14 = vld [vmem:[%s986_s2 + $0x10] sm:$0xff]  ;;  %v103_v16 = vld [vmem:[%s986_s2 + $0x18] sm:$0xff]  ;;  %v23_v17 = vld [vmem:[%s984_s0 + $0x40] sm:$0xff]  ;;  %v751_v32 = vmov 8   ;;  %v752_v36 = vmov 9   ;;  %v753_v40 = vmov 10  }
   0xc   :  { %v24_v19 = vld [vmem:[%s984_s0 + $0x48] sm:$0xff]  ;;  %v25_v20 = vld [vmem:[%s984_s0 + $0x50] sm:$0xff]  ;;  %v26_v21 = vld [vmem:[%s984_s0 + $0x58] sm:$0xff]  ;;  %v754_v42 = vmov 11   ;;  %v755_v46 = vmov 12   ;;  %v756_v48 = vmov 13  }
   0xd   :  { %v27_v22 = vld [vmem:[%s984_s0 + $0x60] sm:$0xff]  ;;  %v28_v23 = vld [vmem:[%s984_s0 + $0x68] sm:$0xff]  ;;  %v29_v25 = vld [vmem:[%s984_s0 + $0x70] sm:$0xff]  ;;  %v757_v57 = vmov 14   ;;  %v758_v0 = vmov 15  }
   0xe   :  { %34 = vxpose.xlu0.b32.cont [4/16] (narrow) %v18_v7, 16  ;;  %v30_v26 = vld [vmem:[%s984_s0 + $0x78] sm:$0xff]  ;;  %s759_s0 = smov [#allocation3]  }
   0xf   :  { %93 = vperm.xlu1 %682, %v813_v8   ;;  %s639_s4 = sshll.u32 %s759_s0, 4  ;;  %s640_s4 = int_to_ptr.vmem [resolvable:$true] %s639_s4 }
  0x10   :  { %s719_s5 = scalar_lea.vmem %s640_s4, 16  ;;  %s723_s6 = scalar_lea.vmem %s640_s4, 32 }
  0x11   :  { %p720_p0 = scmp.ne.s32.totalorder %s640_s4, %s719_s5  ;;  %p724_p1 = scmp.lt.s32.totalorder %s640_s4, %s640_s4 }
  0x12   :  { %35 = vxpose.xlu0.b32.cont [5/16] (narrow) %v19_v9, 16  ;;  %p725_p2 = scmp.lt.s32.totalorder %s723_s6, %s719_s5 }
  0x13   :  { %106 = vperm.xlu1 %682, %v100_v10  }
  0x14   :  { %p726_p3 = por %p725_p2, %p724_p1 }
  0x16   :  { %36 = vxpose.xlu0.b32.cont [6/16] (narrow) %v20_v11, 16  ;;  %p727_p4 = pnand %p726_p3, %p720_p0 }
  0x17   :  { %111 = vperm.xlu1 %682, %v101_v12  }
  0x1a   :  { %37 = vxpose.xlu0.b32.cont [7/16] (narrow) %v21_v13, 16 }
  0x1b   :  { %116 = vperm.xlu1 %682, %v102_v14  }
  0x1e   :  { %38 = vxpose.xlu0.b32.cont [8/16] (narrow) %v22_v15, 16 }
  0x1f   :  { %121 = vperm.xlu1 %682, %v103_v16  }
  0x22   :  { %39 = vxpose.xlu0.b32.cont [9/16] (narrow) %v23_v17, 16 }
  0x23   :  { %683 = vset.pattern.permute.xlu1 %v744_v18 }
  0x24   :  { %134 = vperm.xlu1 %683, %v786_v1  }
  0x26   :  { %40 = vxpose.xlu0.b32.cont [10/16] (narrow) %v24_v19, 16 }
  0x28   :  { %138 = vperm.xlu1 %683, %v795_v4  }
  0x2a   :  { %41 = vxpose.xlu0.b32.cont [11/16] (narrow) %v25_v20, 16 }
  0x2c   :  { %142 = vperm.xlu1 %683, %v804_v6  }
  0x2e   :  { %42 = vxpose.xlu0.b32.cont [12/16] (narrow) %v26_v21, 16 }
  0x30   :  { %146 = vperm.xlu1 %683, %v813_v8  }
  0x32   :  { %43 = vxpose.xlu0.b32.cont [13/16] (narrow) %v27_v22, 16 }
  0x34   :  { %684 = vset.pattern.permute.xlu1 %v745_v24 }
  0x35   :  { %167 = vperm.xlu1 %684, %v786_v1  }
  0x36   :  { %44 = vxpose.xlu0.b32.cont [14/16] (narrow) %v28_v23, 16 }
  0x39   :  { %171 = vperm.xlu1 %684, %v795_v4  }
  0x3a   :  { %45 = vxpose.xlu0.b32.cont [15/16] (narrow) %v29_v25, 16 }
  0x3d   :  { %175 = vperm.xlu1 %684, %v804_v6  }
  0x3e   :  { %46 = vxpose.xlu0.b32.end [16/16] (narrow) %v30_v26, 16 }
  0x41   :  { %179 = vperm.xlu1 %684, %v813_v8  }
  0x45   :  { %686 = vset.pattern.permute.xlu1 %v746_v27 }
  0x46   :  { %204 = vperm.xlu1 %686, %v795_v4  }
  0x4a   :  { %208 = vperm.xlu1 %686, %v804_v6  }
  0x4e   :  { %212 = vperm.xlu1 %686, %v813_v8  }
  0x52   :  { %687 = vset.pattern.permute.xlu1 %v747_v28 }
  0x53   :  { %233 = vperm.xlu1 %687, %v786_v1  }
  0x57   :  { %237 = vperm.xlu1 %687, %v795_v4  }
  0x5b   :  { %241 = vperm.xlu1 %687, %v804_v6  }
  0x5f   :  { %245 = vperm.xlu1 %687, %v813_v8  }
  0x63   :  { %688 = vset.pattern.permute.xlu1 %v748_v29 }
  0x64   :  { %266 = vperm.xlu1 %688, %v786_v1  }
  0x67   :  { %685 = vset.pattern.permute.xlu0 %v746_v27 }
  0x68   :  { %270 = vperm.xlu1 %688, %v795_v4   ;;  %200 = vperm.xlu0 %685, %v786_v1  }
  0x6c   :  { %274 = vperm.xlu1 %688, %v804_v6   ;;  %689 = vset.pattern.permute.xlu0 %v749_v30 }
  0x6d   :  { %299 = vperm.xlu0 %689, %v786_v1  }
  0x70   :  { %278 = vperm.xlu1 %688, %v813_v8  }
  0x71   :  { %311 = vperm.xlu0 %689, %v813_v8  }
  0x74   :  { %690 = vset.pattern.permute.xlu1 %v749_v30 }
  0x75   :  { %303 = vperm.xlu1 %690, %v795_v4   ;;  %692 = vset.pattern.permute.xlu0 %v750_v31 }
  0x76   :  { %336 = vperm.xlu0 %692, %v795_v4  }
  0x79   :  { %307 = vperm.xlu1 %690, %v804_v6  }
  0x7a   :  { %693 = vset.pattern.permute.xlu0 %v751_v32 }
  0x7b   :  { %365 = vperm.xlu0 %693, %v786_v1  }
  0x7d   :  { %691 = vset.pattern.permute.xlu1 %v750_v31 }
  0x7e   :  { %332 = vperm.xlu1 %691, %v786_v1  }
  0x7f   :  { %377 = vperm.xlu0 %693, %v813_v8  }
  0x82   :  { %340 = vperm.xlu1 %691, %v804_v6   ;;  %v79_v33 = vpop.permute.xlu1 %78  ;;  %v47_v34 = vpop.trf.xlu0 }
  0x83   :  { %v647_v35 = vadd.f32 -1.0, %v47_v34  ;;  %696 = vset.pattern.permute.xlu0 %v752_v36 }
  0x84   :  { %402 = vperm.xlu0 %696, %v795_v4  }
  0x85   :  { %65 = vst [vmem:[#allocation2] sm:$0xff] %v647_v35 }
  0x86   :  { %344 = vperm.xlu1 %691, %v813_v8   ;;  %v84_v37 = vpop.permute.xlu1 %83  ;;  %v48_v38 = vpop.trf.xlu0 }
  0x87   :  { %v648_v39 = vadd.f32 -1.0, %v48_v38 }
  0x88   :  { %698 = vset.pattern.permute.xlu0 %v753_v40 }
  0x89   :  { %435 = vperm.xlu0 %698, %v795_v4   ;;  %66 = vst [vmem:[#allocation2 + $0x8] sm:$0xff] %v648_v39 }
  0x8a   :  { %694 = vset.pattern.permute.xlu1 %v751_v32  ;;  %v89_v41 = vpop.permute.xlu1 %88 }
  0x8b   :  { %369 = vperm.xlu1 %694, %v795_v4  }
  0x8c   :  { %v649_v49 = vld [vmem:[#allocation2] ss:$0 sm:$0xff]  ;;  %v650_v53 = vld [vmem:[#allocation2 + $0x1] ss:$0 sm:$0xff]  ;;  %v651_v17 = vld [vmem:[#allocation2 + $0x2] ss:$0 sm:$0xff] }
  0x8d   :  { %701 = vset.pattern.permute.xlu0 %v754_v42  ;;  %v96_v55 = vmul.f32 %v649_v49, %v79_v33  ;;  %v97_v61 = vmul.f32 %v649_v49, %v84_v37  ;;  %v98_v7 = vmul.f32 %v649_v49, %v89_v41  ;;  %v652_v34 = vld [vmem:[#allocation2 + $0x3] ss:$0 sm:$0xff] }
  0x8e   :  { %v94_v43 = vpop.permute.xlu1 %93  ;;  %464 = vperm.xlu0 %701, %v786_v1  }
  0x8f   :  { %373 = vperm.xlu1 %694, %v804_v6   ;;  %v99_v50 = vmul.f32 %v649_v49, %v94_v43 }
  0x92   :  { %v107_v44 = vpop.permute.xlu1 %106  ;;  %472 = vperm.xlu0 %701, %v804_v6  }
  0x93   :  { %695 = vset.pattern.permute.xlu1 %v752_v36  ;;  %v124_v58 = vadd.f32 %v107_v44, %v96_v55 }
  0x94   :  { %398 = vperm.xlu1 %695, %v786_v1  }
  0x96   :  { %v112_v45 = vpop.permute.xlu1 %111  ;;  %705 = vset.pattern.permute.xlu0 %v755_v46 }
  0x97   :  { %501 = vperm.xlu0 %705, %v795_v4   ;;  %v125_v2 = vadd.f32 %v112_v45, %v97_v61 }
  0x98   :  { %406 = vperm.xlu1 %695, %v804_v6  }
  0x9a   :  { %v117_v47 = vpop.permute.xlu1 %116 }
  0x9b   :  { %708 = vset.pattern.permute.xlu0 %v756_v48  ;;  %v126_v11 = vadd.f32 %v117_v47, %v98_v7 }
  0x9c   :  { %697 = vset.pattern.permute.xlu1 %v753_v40  ;;  %530 = vperm.xlu0 %708, %v786_v1  }
  0x9d   :  { %431 = vperm.xlu1 %697, %v786_v1  }
  0x9e   :  { %v122_v51 = vpop.permute.xlu1 %121 }
  0x9f   :  { %v127_v52 = vadd.f32 %v122_v51, %v99_v50 }
  0xa0   :  { %538 = vperm.xlu0 %708, %v804_v6  }
  0xa1   :  { %699 = vset.pattern.permute.xlu1 %v752_v36 }
  0xa2   :  { %410 = vperm.xlu1 %699, %v813_v8  }
  0xa3   :  { %v135_v54 = vpop.permute.xlu1 %134 }
  0xa4   :  { %v149_v56 = vmul.f32 %v650_v53, %v135_v54  ;;  %712 = vset.pattern.permute.xlu0 %v757_v57 }
  0xa5   :  { %567 = vperm.xlu0 %712, %v795_v4  }
  0xa6   :  { %v153_v59 = vadd.f32 1.0, %v149_v56  ;;  %700 = vset.pattern.permute.xlu1 %v753_v40 }
  0xa7   :  { %439 = vperm.xlu1 %700, %v804_v6   ;;  %v139_v60 = vpop.permute.xlu1 %138 }
  0xa8   :  { %v157_v62 = vmul.f32 %v153_v59, %v124_v58  ;;  %v150_v63 = vmul.f32 %v650_v53, %v139_v60 }
  0xa9   :  { %715 = vset.pattern.permute.xlu0 %v758_v0 }
  0xaa   :  { %v154_v3 = vadd.f32 1.0, %v150_v63  ;;  %596 = vperm.xlu0 %715, %v786_v1   ;;  %v654_v63 = vld [vmem:[#allocation2 + $0x5] ss:$0 sm:$0xff] }
  0xab   :  { %702 = vset.pattern.permute.xlu1 %v754_v42  ;;  %v143_v5 = vpop.permute.xlu1 %142 }
  0xac   :  { %v158_v9 = vmul.f32 %v154_v3, %v125_v2  ;;  %v151_v10 = vmul.f32 %v650_v53, %v143_v5  ;;  %468 = vperm.xlu1 %702, %v795_v4  }
  0xae   :  { %v155_v12 = vadd.f32 1.0, %v151_v10  ;;  %604 = vperm.xlu0 %715, %v804_v6  }
  0xaf   :  { %v147_v13 = vpop.permute.xlu1 %146 }
  0xb0   :  { %v159_v14 = vmul.f32 %v155_v12, %v126_v11  ;;  %v152_v15 = vmul.f32 %v650_v53, %v147_v13  ;;  %703 = vset.pattern.permute.xlu1 %v753_v40 }
  0xb1   :  { %443 = vperm.xlu1 %703, %v813_v8  }
  0xb2   :  { %v156_v16 = vadd.f32 1.0, %v152_v15 }
  0xb4   :  { %v160_v18 = vmul.f32 %v156_v16, %v127_v52  ;;  %v168_v19 = vpop.permute.xlu1 %167 }
  0xb5   :  { %v182_v20 = vmul.f32 %v651_v17, %v168_v19  ;;  %704 = vset.pattern.permute.xlu1 %v755_v46 }
  0xb6   :  { %497 = vperm.xlu1 %704, %v786_v1  }
  0xb7   :  { %v186_v21 = vadd.f32 1.0, %v182_v20 }
  0xb8   :  { %v172_v22 = vpop.permute.xlu1 %171 }
  0xb9   :  { %v925_v23 = vmul.f32 %v186_v21, %v157_v62  ;;  %v183_v24 = vmul.f32 %v651_v17, %v172_v22  ;;  %v655_v22 = vld [vmem:[#allocation2 + $0x6] ss:$0 sm:$0xff] }
  0xba   :  { %706 = vset.pattern.permute.xlu1 %v754_v42 }
  0xbb   :  { %v187_v25 = vadd.f32 1.0, %v183_v24  ;;  %476 = vperm.xlu1 %706, %v813_v8  }
  0xbc   :  { %v176_v26 = vpop.permute.xlu1 %175 }
  0xbd   :  { %v191_v27 = vmul.f32 %v187_v25, %v158_v9  ;;  %v184_v28 = vmul.f32 %v651_v17, %v176_v26 }
  0xbf   :  { %v188_v29 = vadd.f32 1.0, %v184_v28  ;;  %707 = vset.pattern.permute.xlu1 %v755_v46 }
  0xc0   :  { %505 = vperm.xlu1 %707, %v804_v6   ;;  %v180_v30 = vpop.permute.xlu1 %179 }
  0xc1   :  { %v192_v31 = vmul.f32 %v188_v29, %v159_v14  ;;  %v185_v32 = vmul.f32 %v651_v17, %v180_v30 }
  0xc3   :  { %v189_v33 = vadd.f32 1.0, %v185_v32 }
  0xc4   :  { %709 = vset.pattern.permute.xlu1 %v756_v48 }
  0xc5   :  { %v193_v35 = vmul.f32 %v189_v33, %v160_v18  ;;  %534 = vperm.xlu1 %709, %v795_v4   ;;  %v205_v36 = vpop.permute.xlu1 %204 }
  0xc6   :  { %v216_v37 = vmul.f32 %v652_v34, %v205_v36 }
  0xc8   :  { %v220_v38 = vadd.f32 1.0, %v216_v37 }
  0xc9   :  { %710 = vset.pattern.permute.xlu1 %v755_v46  ;;  %v209_v39 = vpop.permute.xlu1 %208  ;;  %v653_v46 = vld [vmem:[#allocation2 + $0x4] ss:$0 sm:$0xff] }
  0xca   :  { %v224_v40 = vmul.f32 %v220_v38, %v191_v27  ;;  %v217_v41 = vmul.f32 %v652_v34, %v209_v39  ;;  %509 = vperm.xlu1 %710, %v813_v8  }
  0xcc   :  { %v221_v42 = vadd.f32 1.0, %v217_v41 }
  0xcd   :  { %v213_v43 = vpop.permute.xlu1 %212 }
  0xce   :  { %v225_v44 = vmul.f32 %v221_v42, %v192_v31  ;;  %v218_v45 = vmul.f32 %v652_v34, %v213_v43  ;;  %711 = vset.pattern.permute.xlu1 %v757_v57 }
  0xcf   :  { %563 = vperm.xlu1 %711, %v786_v1  }
  0xd0   :  { %v222_v47 = vadd.f32 1.0, %v218_v45 }
  0xd2   :  { %v226_v49 = vmul.f32 %v222_v47, %v193_v35  ;;  %v234_v50 = vpop.permute.xlu1 %233 }
  0xd3   :  { %713 = vset.pattern.permute.xlu1 %v756_v48  ;;  %v248_v3 = vmul.f32 %v653_v46, %v234_v50 }
  0xd4   :  { %542 = vperm.xlu1 %713, %v813_v8  }
  0xd5   :  { %v252_v12 = vadd.f32 1.0, %v248_v3 }
  0xd6   :  { %v238_v51 = vpop.permute.xlu1 %237 }
  0xd7   :  { %v249_v52 = vmul.f32 %v653_v46, %v238_v51 }
  0xd8   :  { %714 = vset.pattern.permute.xlu1 %v757_v57 }
  0xd9   :  { %v253_v53 = vadd.f32 1.0, %v249_v52  ;;  %571 = vperm.xlu1 %714, %v804_v6  }
  0xda   :  { %v242_v54 = vpop.permute.xlu1 %241 }
  0xdb   :  { %v257_v55 = vmul.f32 %v253_v53, %v224_v40  ;;  %v250_v56 = vmul.f32 %v653_v46, %v242_v54 }
  0xdd   :  { %v254_v58 = vadd.f32 1.0, %v250_v56  ;;  %716 = vset.pattern.permute.xlu1 %v758_v0 }
  0xde   :  { %600 = vperm.xlu1 %716, %v795_v4   ;;  %v246_v1 = vpop.permute.xlu1 %245 }
  0xdf   :  { %v258_v48 = vmul.f32 %v254_v58, %v225_v44  ;;  %v251_v59 = vmul.f32 %v653_v46, %v246_v1 }
  0xe1   :  { %v255_v60 = vadd.f32 1.0, %v251_v59 }
  0xe2   :  { %717 = vset.pattern.permute.xlu1 %v757_v57 }
  0xe3   :  { %v259_v61 = vmul.f32 %v255_v60, %v226_v49  ;;  %575 = vperm.xlu1 %717, %v813_v8   ;;  %v267_v62 = vpop.permute.xlu1 %266 }
  0xe4   :  { %v281_v4 = vmul.f32 %v654_v63, %v267_v62 }
  0xe6   :  { %v285_v15 = vadd.f32 1.0, %v281_v4 }
  0xe7   :  { %718 = vset.pattern.permute.xlu1 %v758_v0  ;;  %v271_v6 = vpop.permute.xlu1 %270  ;;  %v201_v2 = vpop.permute.xlu0 %200 }
  0xe8   :  { %v282_v5 = vmul.f32 %v654_v63, %v271_v6  ;;  %v215_v7 = vmul.f32 %v652_v34, %v201_v2  ;;  %608 = vperm.xlu1 %718, %v813_v8   ;;  %v656_v34 = vld [vmem:[#allocation2 + $0x7] ss:$0 sm:$0xff] }
  0xea   :  { %v286_v9 = vadd.f32 1.0, %v282_v5  ;;  %v219_v10 = vadd.f32 1.0, %v215_v7 }
  0xeb   :  { %v275_v11 = vpop.permute.xlu1 %274 }
  0xec   :  { %v290_v57 = vmul.f32 %v286_v9, %v257_v55  ;;  %v223_v13 = vmul.f32 %v219_v10, %v925_v23  ;;  %v283_v14 = vmul.f32 %v654_v63, %v275_v11  ;;  %v300_v25 = vpop.permute.xlu0 %299 }
  0xed   :  { %v314_v28 = vmul.f32 %v655_v22, %v300_v25 }
  0xee   :  { %v256_v16 = vmul.f32 %v252_v12, %v223_v13  ;;  %v287_v17 = vadd.f32 1.0, %v283_v14  ;;  %v657_v12 = vld [vmem:[#allocation2 + $0x8] ss:$0 sm:$0xff]  ;;  %v658_v14 = vld [vmem:[#allocation2 + $0x9] ss:$0 sm:$0xff] }
  0xef   :  { %v279_v0 = vpop.permute.xlu1 %278  ;;  %v318_v32 = vadd.f32 1.0, %v314_v28 }
  0xf0   :  { %v291_v18 = vmul.f32 %v287_v17, %v258_v48  ;;  %v289_v19 = vmul.f32 %v285_v15, %v256_v16  ;;  %v284_v20 = vmul.f32 %v654_v63, %v279_v0  ;;  %v312_v33 = vpop.permute.xlu0 %311 }
  0xf1   :  { %v317_v39 = vmul.f32 %v655_v22, %v312_v33 }
  0xf2   :  { %v288_v21 = vadd.f32 1.0, %v284_v20  ;;  %v322_v38 = vmul.f32 %v318_v32, %v289_v19  ;;  %v659_v20 = vld [vmem:[#allocation2 + $0xa] ss:$0 sm:$0xff] }
  0xf3   :  { %v321_v44 = vadd.f32 1.0, %v317_v39 }
  0xf4   :  { %v292_v24 = vmul.f32 %v288_v21, %v259_v61  ;;  %v304_v8 = vpop.permute.xlu1 %303 }
  0xf5   :  { %v315_v26 = vmul.f32 %v655_v22, %v304_v8  ;;  %v337_v56 = vpop.permute.xlu0 %336 }
  0xf6   :  { %v325_v46 = vmul.f32 %v321_v44, %v292_v24  ;;  %v348_v11 = vmul.f32 %v656_v34, %v337_v56 }
  0xf7   :  { %v319_v27 = vadd.f32 1.0, %v315_v26  ;;  %v960_v26 = vld [vmem:[#allocation2 + $0xb] ss:$0 sm:$0xff] }
  0xf8   :  { %v308_v29 = vpop.permute.xlu1 %307  ;;  %v352_v16 = vadd.f32 1.0, %v348_v11 }
  0xf9   :  { %v323_v30 = vmul.f32 %v319_v27, %v290_v57  ;;  %v316_v31 = vmul.f32 %v655_v22, %v308_v29 }
  0xfa   :  { %v366_v1 = vpop.permute.xlu0 %365 }
  0xfb   :  { %v320_v23 = vadd.f32 1.0, %v316_v31  ;;  %v380_v17 = vmul.f32 %v657_v12, %v366_v1  ;;  %v356_v24 = vmul.f32 %v352_v16, %v323_v30  ;;  %v663_v16 = vld [vmem:[#allocation2 + $0xe] ss:$0 sm:$0xff] }
  0xfd   :  { %v324_v35 = vmul.f32 %v320_v23, %v291_v18  ;;  %v333_v36 = vpop.permute.xlu1 %332  ;;  %v384_v25 = vadd.f32 1.0, %v380_v17 }
  0xfe   :  { %v347_v37 = vmul.f32 %v656_v34, %v333_v36  ;;  %v950_v59 = vpop.permute.xlu0 %377 }
 0x100   :  { %v351_v40 = vadd.f32 1.0, %v347_v37 }
 0x101   :  { %v341_v41 = vpop.permute.xlu1 %340 }
 0x102   :  { %v355_v42 = vmul.f32 %v351_v40, %v322_v38  ;;  %v349_v43 = vmul.f32 %v656_v34, %v341_v41  ;;  %v661_v38 = vld [vmem:[#allocation2 + $0xc] ss:$0 sm:$0xff] }
 0x103   :  { %v403_v61 = vpop.permute.xlu0 %402 }
 0x104   :  { %v353_v45 = vadd.f32 1.0, %v349_v43  ;;  %v414_v18 = vmul.f32 %v658_v14, %v403_v61  ;;  %v388_v36 = vmul.f32 %v384_v25, %v355_v42  ;;  %v662_v42 = vld [vmem:[#allocation2 + $0xd] ss:$0 sm:$0xff] }
 0x105   :  { %v345_v47 = vpop.permute.xlu1 %344 }
 0x106   :  { %v357_v49 = vmul.f32 %v353_v45, %v324_v35  ;;  %v350_v50 = vmul.f32 %v656_v34, %v345_v47  ;;  %v418_v31 = vadd.f32 1.0, %v414_v18 }
 0x108   :  { %v354_v51 = vadd.f32 1.0, %v350_v50  ;;  %v436_v63 = vpop.permute.xlu0 %435 }
 0x109   :  { %v447_v23 = vmul.f32 %v659_v20, %v436_v63 }
 0x10a   :  { %v948_v52 = vmul.f32 %v354_v51, %v325_v46  ;;  %v370_v53 = vpop.permute.xlu1 %369 }
 0x10b   :  { %v381_v13 = vmul.f32 %v657_v12, %v370_v53  ;;  %v451_v44 = vadd.f32 1.0, %v447_v23 }
 0x10d   :  { %v465_v2 = vpop.permute.xlu0 %464  ;;  %v385_v0 = vadd.f32 1.0, %v381_v13 }
 0x10e   :  { %v374_v54 = vpop.permute.xlu1 %373  ;;  %v479_v35 = vmul.f32 %v960_v26, %v465_v2 }
 0x10f   :  { %v382_v19 = vmul.f32 %v657_v12, %v374_v54  ;;  %v389_v29 = vmul.f32 %v385_v0, %v356_v24 }
 0x110   :  { %v483_v53 = vadd.f32 1.0, %v479_v35 }
 0x111   :  { %v473_v7 = vpop.permute.xlu0 %472  ;;  %v386_v32 = vadd.f32 1.0, %v382_v19  ;;  %v422_v43 = vmul.f32 %v418_v31, %v389_v29 }
 0x112   :  { %v481_v45 = vmul.f32 %v960_v26, %v473_v7  ;;  %v383_v7 = vmul.f32 %v657_v12, %v950_v59 }
 0x113   :  { %v399_v55 = vpop.permute.xlu1 %398  ;;  %v390_v47 = vmul.f32 %v386_v32, %v357_v49 }
 0x114   :  { %v413_v21 = vmul.f32 %v658_v14, %v399_v55 }
 0x116   :  { %v502_v9 = vpop.permute.xlu0 %501  ;;  %v417_v33 = vadd.f32 1.0, %v413_v21 }
 0x117   :  { %v407_v58 = vpop.permute.xlu1 %406  ;;  %v513_v54 = vmul.f32 %v661_v38, %v502_v9 }
 0x118   :  { %v415_v27 = vmul.f32 %v658_v14, %v407_v58  ;;  %v421_v50 = vmul.f32 %v417_v33, %v388_v36 }
 0x119   :  { %v517_v49 = vadd.f32 1.0, %v513_v54 }
 0x11a   :  { %v419_v37 = vadd.f32 1.0, %v415_v27 }
 0x11b   :  { %v531_v57 = vpop.permute.xlu0 %530 }
 0x11c   :  { %v432_v48 = vpop.permute.xlu1 %431  ;;  %v423_v55 = vmul.f32 %v419_v37, %v390_v47  ;;  %v545_v13 = vmul.f32 %v662_v42, %v531_v57 }
 0x11d   :  { %v446_v28 = vmul.f32 %v659_v20, %v432_v48  ;;  %v455_v48 = vmul.f32 %v451_v44, %v422_v43 }
 0x11e   :  { %v549_v12 = vadd.f32 1.0, %v545_v13 }
 0x11f   :  { %v539_v22 = vpop.permute.xlu0 %538  ;;  %v450_v39 = vadd.f32 1.0, %v446_v28  ;;  %v387_v28 = vadd.f32 1.0, %v383_v7 }
 0x120   :  { %v547_v19 = vmul.f32 %v662_v42, %v539_v22 }
 0x121   :  { %v952_v60 = vpop.permute.xlu1 %410  ;;  %v454_v56 = vmul.f32 %v450_v39, %v421_v50  ;;  %v391_v37 = vmul.f32 %v387_v28, %v948_v52 }
 0x122   :  { %v416_v18 = vmul.f32 %v658_v14, %v952_v60  ;;  %v551_v14 = vadd.f32 1.0, %v547_v19 }
 0x123   :  { %v487_v17 = vmul.f32 %v483_v53, %v454_v56 }
 0x124   :  { %v568_v30 = vpop.permute.xlu0 %567  ;;  %v420_v33 = vadd.f32 1.0, %v416_v18 }
 0x125   :  { %v579_v29 = vmul.f32 %v663_v16, %v568_v30 }
 0x126   :  { %v440_v62 = vpop.permute.xlu1 %439 }
 0x127   :  { %v448_v34 = vmul.f32 %v659_v20, %v440_v62  ;;  %v485_v62 = vadd.f32 1.0, %v481_v45  ;;  %v583_v39 = vadd.f32 1.0, %v579_v29  ;;  %v424_v45 = vmul.f32 %v420_v33, %v391_v37 }
 0x129   :  { %v452_v46 = vadd.f32 1.0, %v448_v34 }
 0x12b   :  { %v469_v6 = vpop.permute.xlu1 %468  ;;  %v456_v63 = vmul.f32 %v452_v46, %v423_v55 }
 0x12c   :  { %v480_v40 = vmul.f32 %v960_v26, %v469_v6  ;;  %v597_v6 = vpop.permute.xlu0 %596 }
 0x12d   :  { %v489_v24 = vmul.f32 %v485_v62, %v456_v63 }
 0x12e   :  { %v484_v58 = vadd.f32 1.0, %v480_v40 }
 0x130   :  { %v954_v3 = vpop.permute.xlu1 %443  ;;  %v605_v57 = vpop.permute.xlu0 %604 }
 0x135   :  { %v498_v5 = vpop.permute.xlu1 %497 }
 0x136   :  { %v512_v51 = vmul.f32 %v661_v38, %v498_v5  ;;  %v488_v5 = vmul.f32 %v484_v58, %v455_v48 }
 0x138   :  { %v516_v2 = vadd.f32 1.0, %v512_v51  ;;  %v521_v23 = vmul.f32 %v517_v49, %v488_v5 }
 0x13a   :  { %v956_v4 = vpop.permute.xlu1 %476  ;;  %v520_v21 = vmul.f32 %v516_v2, %v487_v17 }
 0x13b   :  { %v482_v60 = vmul.f32 %v960_v26, %v956_v4 }
 0x13c   :  { %v553_v35 = vmul.f32 %v549_v12, %v520_v21 }
 0x13d   :  { %v486_v50 = vadd.f32 1.0, %v482_v60 }
 0x13f   :  { %v506_v10 = vpop.permute.xlu1 %505 }
 0x140   :  { %v514_v1 = vmul.f32 %v661_v38, %v506_v10  ;;  %v664_v10 = vld [vmem:[#allocation2 + $0xf] ss:$0 sm:$0xff] }
 0x141   :  { %v611_v34 = vmul.f32 %v664_v10, %v597_v6  ;;  %v613_v30 = vmul.f32 %v664_v10, %v605_v57 }
 0x142   :  { %v518_v9 = vadd.f32 1.0, %v514_v1 }
 0x143   :  { %v615_v47 = vadd.f32 1.0, %v611_v34  ;;  %v617_v53 = vadd.f32 1.0, %v613_v30 }
 0x144   :  { %v535_v15 = vpop.permute.xlu1 %534  ;;  %v522_v31 = vmul.f32 %v518_v9, %v489_v24 }
 0x145   :  { %v546_v11 = vmul.f32 %v662_v42, %v535_v15  ;;  %v449_v15 = vmul.f32 %v659_v20, %v954_v3 }
 0x146   :  { %v555_v43 = vmul.f32 %v551_v14, %v522_v31 }
 0x147   :  { %v550_v25 = vadd.f32 1.0, %v546_v11  ;;  %v453_v3 = vadd.f32 1.0, %v449_v15 }
 0x149   :  { %v958_v8 = vpop.permute.xlu1 %509  ;;  %v554_v22 = vmul.f32 %v550_v25, %v521_v23  ;;  %v457_v54 = vmul.f32 %v453_v3, %v424_v45 }
 0x14a   :  { %v515_v40 = vmul.f32 %v661_v38, %v958_v8 }
 0x14b   :  { %v587_v26 = vmul.f32 %v583_v39, %v554_v22  ;;  %v490_v48 = vmul.f32 %v486_v50, %v457_v54 }
 0x14c   :  { %v519_v55 = vadd.f32 1.0, %v515_v40 }
 0x14e   :  { %v564_v41 = vpop.permute.xlu1 %563  ;;  %v523_v63 = vmul.f32 %v519_v55, %v490_v48 }
 0x14f   :  { %v578_v0 = vmul.f32 %v663_v16, %v564_v41 }
 0x151   :  { %v582_v32 = vadd.f32 1.0, %v578_v0 }
 0x153   :  { %v543_v61 = vpop.permute.xlu1 %542  ;;  %v586_v41 = vmul.f32 %v582_v32, %v553_v35 }
 0x154   :  { %v548_v46 = vmul.f32 %v662_v42, %v543_v61 }
 0x155   :  { %v619_v52 = vmul.f32 %v615_v47, %v586_v41 }
 0x156   :  { %v552_v62 = vadd.f32 1.0, %v548_v46 }
 0x158   :  { %v572_v27 = vpop.permute.xlu1 %571  ;;  %v556_v7 = vmul.f32 %v552_v62, %v523_v63 }
 0x159   :  { %v580_v59 = vmul.f32 %v663_v16, %v572_v27 }
 0x15b   :  { %v584_v36 = vadd.f32 1.0, %v580_v59 }
 0x15d   :  { %v601_v20 = vpop.permute.xlu1 %600  ;;  %v588_v4 = vmul.f32 %v584_v36, %v555_v43 }
 0x15e   :  { %v612_v44 = vmul.f32 %v664_v10, %v601_v20 }
 0x15f   :  { %v621_v8 = vmul.f32 %v617_v53, %v588_v4 }
 0x160   :  { %v616_v51 = vadd.f32 1.0, %v612_v44 }
 0x162   :  { %v620_v56 = vmul.f32 %v616_v51, %v587_v26  ;;  %v576_v58 = vpop.permute.xlu1 %575 }
 0x163   :  { %v581_v1 = vmul.f32 %v663_v16, %v576_v58 }
 0x164   :  { %v623_v38 = vadd.f32 %v620_v56, %v619_v52 }
 0x165   :  { %v585_v6 = vadd.f32 1.0, %v581_v1 }
 0x166   :  { %v624_v2 = vadd.f32 %v623_v38, %v621_v8 }
 0x167   :  { %v609_v11 = vpop.permute.xlu1 %608  ;;  %v589_v61 = vmul.f32 %v585_v6, %v556_v7 }
 0x168   :  { %v614_v42 = vmul.f32 %v664_v10, %v609_v11 }
 0x16a   :  { %v618_v49 = vadd.f32 1.0, %v614_v42 }
 0x16c   :  { %v622_v13 = vmul.f32 %v618_v49, %v589_v61 }
 0x16e   :  { %v625_v5 = vadd.f32 %v624_v2, %v622_v13 }
 0x170   :  { %v626_v17 = vrot.slane %v625_v5, 4 }
 0x172   :  { %v627_v9 = vadd.f32 %v626_v17, %v625_v5 }
 0x174   :  { %v628_v0 = vrot.slane %v627_v9, 2 }
 0x176   :  { %v629_v18 = vadd.f32 %v628_v0, %v627_v9 }
 0x178   :  { %v630_v16 = vrot.slane %v629_v18, 1 }
 0x17a   :  { %v631_v19 = vadd.f32 %v630_v16, %v629_v18 }
 0x17c   :  { %632 = vst [vmem:[#allocation3] sm:$0x1] %v631_v19 }
 0x17d   :  { %730 = shalt.err (!%p727_p4)
}
 0x17e   :  { %s731_s8 = scalar_lea.hbm %s987_s3, 16 }
 0x17f   :  { %p732_p5 = scmp.ne.s32.totalorder %s987_s3, %s731_s8  ;;  %p735_p6 = scmp.lt.u32.totalorder %s731_s8, %s987_s3 }
 0x181   :  { %p737_p7 = pnand %p735_p6, %p732_p5 }
 0x183   :  { %740 = shalt.err (!%p737_p7)
}
 0x184   :  { %642 = dma.vmem_to_hbm [thread:$0]  %s640_s4, 16, %s987_s3, [#allocation4]  }
 0x185   :  { %741 = dma.done.wait [#allocation4], 16  }
 0x186   :  { %742 = vsyncadd [#allocation4], 4294967280 }
 0x187   :  { %646 = vsyncpa [#allocation4], 1 }

</bundles_post_ra>
